<compile_context>
chip_gen: v6e
topology: v6e:2x2x1
jax: 0.10.0
libtpu: 0.0.40
codegen_flags: <defaults>
</compile_context>

<pallas_src>
import functools

import jax
import jax.numpy as jnp
from jax import lax
from jax.experimental import pallas as pl
from jax.experimental.pallas import tpu as pltpu


def _round_up(x, m):
    return (x + m - 1) // m * m


def _cparams(dim_sem, est_bytes):
    """CompilerParams with an explicit scoped-VMEM limit (block footprint x2 + slack,
    clamped to [32 MiB, 64 MiB] so it is valid on v5e/v6e/v7x)."""
    lim = int(min(max(2 * est_bytes + (16 << 20), 32 << 20), 64 << 20))
    return pltpu.CompilerParams(dimension_semantics=dim_sem, vmem_limit_bytes=lim)


# ----------------------------- frontend (convs + fusion MLP) ----------------------

def _conv3_taps_relu(x, w, b, T):
    """kernel-3 'same' conv as 3 per-tap matmuls + XLU roll shifts + boundary masks.

    x: (T, Cin) f32, w: (3, Cin, Cout) bf16, b: (1, Cout) f32 -> (T, Cout) f32.
    y[t] = relu(x[t-1] @ w[0] + x[t] @ w[1] + x[t+1] @ w[2] + b) with zero padding.
    """
    xb = x.astype(jnp.bfloat16)
    z0 = jnp.dot(xb, w[0], preferred_element_type=jnp.float32)
    z1 = jnp.dot(xb, w[1], preferred_element_type=jnp.float32)
    z2 = jnp.dot(xb, w[2], preferred_element_type=jnp.float32)
    rix = lax.broadcasted_iota(jnp.int32, z0.shape, 0)
    z0s = jnp.where(rix == 0, 0.0, pltpu.roll(z0, 1, 0))          # contributes x[t-1]
    z2s = jnp.where(rix == T - 1, 0.0, pltpu.roll(z2, T - 1, 0))  # contributes x[t+1]
    return jnp.maximum(z0s + z1 + z2s + b, 0.0)


def _frontend_kernel(mel_ref, f0_ref, ph_ref, sg_ref, lg_ref,
                     wm0_ref, bm0_ref, wm1_ref, bm1_ref, wf0_ref, bf0_ref,
                     w0m_ref, w0f_ref, w0p_ref, w0s_ref, w0l_ref, b0_ref,
                     w1_ref, b1_ref, out_ref):
    T = mel_ref.shape[1]

    # mel conv stack (Dropout == identity at inference)
    m = _conv3_taps_relu(mel_ref[0], wm0_ref[...], bm0_ref[...], T)     # (T, 128)
    mel_feat = _conv3_taps_relu(m, wm1_ref[...], bm1_ref[...], T)       # (T, 128)

    # f0 conv (Cin == 1): VPU broadcast-multiply taps + roll shifts
    f0 = f0_ref[0]                                                      # (T, 1)
    wf = wf0_ref[...]                                                   # (3, 1, 32)
    z0 = f0 * wf[0]
    z1 = f0 * wf[1]
    z2 = f0 * wf[2]
    rix = lax.broadcasted_iota(jnp.int32, z0.shape, 0)
    z0s = jnp.where(rix == 0, 0.0, pltpu.roll(z0, 1, 0))
    z2s = jnp.where(rix == T - 1, 0.0, pltpu.roll(z2, T - 1, 0))
    f0_feat = jnp.maximum(z0s + z1 + z2s + bf0_ref[...], 0.0)           # (T, 32)

    # fusion layer 0 as split matmuls; singer/language row computed once per batch.
    sl_row = (jnp.dot(sg_ref[0].astype(jnp.bfloat16), w0s_ref[...],
                      preferred_element_type=jnp.float32)
              + jnp.dot(lg_ref[0].astype(jnp.bfloat16), w0l_ref[...],
                        preferred_element_type=jnp.float32)
              + b0_ref[...])                                            # (1, 256)
    f = (jnp.dot(mel_feat.astype(jnp.bfloat16), w0m_ref[...],
                 preferred_element_type=jnp.float32)
         + jnp.dot(f0_feat.astype(jnp.bfloat16), w0f_ref[...],
                   preferred_element_type=jnp.float32)
         + jnp.dot(ph_ref[0].astype(jnp.bfloat16), w0p_ref[...],
                   preferred_element_type=jnp.float32)
         + sl_row)
    f = jnp.maximum(f, 0.0)
    # fusion layer 1
    f = jnp.dot(f.astype(jnp.bfloat16), w1_ref[...],
                preferred_element_type=jnp.float32) + b1_ref[...]
    out_ref[...] = jnp.maximum(f, 0.0)[None]


def frontend(mel, f0_3d, phoneme, singer3, lang3, wm0, bm0, wm1, bm1, wf0, bf0,
             w0m, w0f, w0p, w0s, w0l, b0, w1, b1):
    # TODO(synk): on v7x with B == 1, add a second "parallel" grid axis over T-tiles
    # (1-row conv halo) so both TensorCores are occupied.
    B, T, n_mels = mel.shape
    P = phoneme.shape[-1]
    S = singer3.shape[-1]
    L = lang3.shape[-1]
    E = w1.shape[1]

    def full2(arr):
        return pl.BlockSpec(arr.shape, lambda b: (0, 0))

    def full3(arr):
        return pl.BlockSpec(arr.shape, lambda b: (0, 0, 0))

    est = 4 * T * (n_mels + 1 + P + 6 * 128 + 3 * E)   # per-block f32 activations
    return pl.pallas_call(
        _frontend_kernel,
        out_shape=jax.ShapeDtypeStruct((B, T, E), jnp.float32),
        grid=(B,),
        in_specs=[pl.BlockSpec((1, T, n_mels), lambda b: (b, 0, 0)),
                  pl.BlockSpec((1, T, 1), lambda b: (b, 0, 0)),
                  pl.BlockSpec((1, T, P), lambda b: (b, 0, 0)),
                  pl.BlockSpec((1, 1, S), lambda b: (b, 0, 0)),
                  pl.BlockSpec((1, 1, L), lambda b: (b, 0, 0)),
                  full3(wm0), full2(bm0), full3(wm1), full2(bm1),
                  full3(wf0), full2(bf0),
                  full2(w0m), full2(w0f), full2(w0p), full2(w0s), full2(w0l), full2(b0),
                  full2(w1), full2(b1)],
        out_specs=pl.BlockSpec((1, T, E), lambda b: (b, 0, 0)),
        compiler_params=_cparams(("parallel",), est),
    )(mel, f0_3d, phoneme, singer3, lang3, wm0, bm0, wm1, bm1, wf0, bf0,
      w0m, w0f, w0p, w0s, w0l, b0, w1, b1)


# ----------------------------- bidirectional GRU layer ----------------------------

def _gru_bidir_kernel(x_ref, wih_ref, bih_ref, whh_ref, bhh_ref, o_ref, *, buf):
    """Single program: forward & backward chains interleaved, input proj fused.

    x_ref  : (B, T, Din) f32
    wih_ref: (Din, 6H) bf16   bih_ref: (1, 6H) f32
    whh_ref: (H, 6H)  bf16    bhh_ref: (1, 6H) f32
    o_ref  : (B, T, 2H) f32   (fwd hidden in [:, :, 0:H], bwd in [:, :, H:2H])
    """
    B, T, Din = x_ref.shape
    H = whh_ref.shape[0]
    H3 = 3 * H

    # hoisted, loop-invariant weight loads
    wih = wih_ref[...]
    whh = whh_ref[...]
    bih = bih_ref[...]
    bhh = bhh_ref[...]
    wih_f, wih_b = wih[:, :H3], wih[:, H3:]
    whh_f, whh_b = whh[:, :H3], whh[:, H3:]
    bih_f, bih_b = bih[:, :H3], bih[:, H3:]
    bhh_f, bhh_b = bhh[:, :H3], bhh[:, H3:]

    def cell(gx, h, whh_d, bhh_d):
        gh = jnp.dot(h.astype(jnp.bfloat16), whh_d,
                     preferred_element_type=jnp.float32) + bhh_d
        r = jax.nn.sigmoid(gx[:, 0:H] + gh[:, 0:H])
        z = jax.nn.sigmoid(gx[:, H:2 * H] + gh[:, H:2 * H])
        n = jnp.tanh(gx[:, 2 * H:H3] + r * gh[:, 2 * H:H3])
        return (1.0 - z) * n + z * h                        # f32 recurrent state

    def proj(xc, w, bias, n):
        # fused input projection for a whole chunk (independent of h -> MXU filler)
        y = jnp.dot(xc.reshape(B * n, Din).astype(jnp.bfloat16), w,
                    preferred_element_type=jnp.float32) + bias
        return y.reshape(B, n, H3)

    def run_chunk(h_f, h_b, fstart, bstart, n):
        gxf = proj(x_ref[:, pl.ds(fstart, n), :], wih_f, bih_f, n)   # one dense load
        gxb = proj(x_ref[:, pl.ds(bstart, n), :], wih_b, bih_b, n)
        hfs, hbs = [], []
        for j in range(n):                     # unrolled; two independent h chains
            h_f = cell(gxf[:, j, :], h_f, whh_f, bhh_f)
            h_b = cell(gxb[:, n - 1 - j, :], h_b, whh_b, bhh_b)
            hfs.append(h_f)
            hbs.append(h_b)
        # flush n timesteps at once (sublane-dense, time-ascending stores)
        o_ref[:, pl.ds(fstart, n), 0:H] = jnp.stack(hfs, axis=1)
        o_ref[:, pl.ds(bstart, n), H:2 * H] = jnp.stack(hbs[::-1], axis=1)
        return h_f, h_b

    n_full = T // buf
    rem = T % buf

    def chunk(c, carry):
        h_f, h_b = carry
        fstart = pl.multiple_of(c * buf, buf)
        bstart = T - buf - c * buf
        return run_chunk(h_f, h_b, fstart, bstart, buf)

    h0 = jnp.zeros((B, H), jnp.float32)
    h_f, h_b = lax.fori_loop(0, n_full, chunk, (h0, h0))

    if rem:
        # static ragged tail: fwd covers the last `rem` steps, bwd the first `rem`
        run_chunk(h_f, h_b, n_full * buf, 0, rem)


def gru_bidir(x, wih, bih, whh, bhh):
    """One bidirectional GRU layer (PyTorch layout: output = [fwd || bwd] features).

    x: [B, T, Din] f32, wih: [Din, 6H] bf16, bih: [1, 6H] f32,
    whh: [H, 6H] bf16, bhh: [1, 6H] f32 -> [B, T, 2H] f32.
    """
    # TODO(synk): on v7x (2 TensorCores) add a "parallel" grid over batch halves when
    # B is even; on v5e/v6e a single interleaved program is faster (recurrence is
    # MXU-latency bound).
    B, T, Din = x.shape
    H6 = whh.shape[1]
    H = H6 // 6
    est = 4 * B * T * (Din + 2 * H) + 2 * (Din + H) * H6 + 4 * B * 16 * H6
    return pl.pallas_call(
        functools.partial(_gru_bidir_kernel, buf=8),
        out_shape=jax.ShapeDtypeStruct((B, T, 2 * H), jnp.float32),
        grid=(1,),
        in_specs=[pl.BlockSpec((B, T, Din), lambda i: (0, 0, 0)),
                  pl.BlockSpec((Din, H6), lambda i: (0, 0)),
                  pl.BlockSpec((1, H6), lambda i: (0, 0)),
                  pl.BlockSpec((H, H6), lambda i: (0, 0)),
                  pl.BlockSpec((1, H6), lambda i: (0, 0))],
        out_specs=pl.BlockSpec((B, T, 2 * H), lambda i: (0, 0, 0)),
        compiler_params=_cparams(("arbitrary",), est),
    )(x, wih, bih, whh, bhh)


# ----------------------------- self-attention (QKV + out proj fused) --------------

def _attn_kernel(x_ref, wqkv_ref, bqkv_ref, wo_ref, bo_ref, o_ref, *, num_heads, scale):
    # TODO(synk): for very long T (>~2k, esp. v7x 64 MiB VMEM) switch to a flash-style
    # key-tiled inner loop with online softmax instead of whole-T (T, T) scores.
    T, E = x_ref.shape[1], x_ref.shape[2]
    hd = E // num_heads
    x = x_ref[0].astype(jnp.bfloat16)
    qkv = jnp.dot(x, wqkv_ref[...], preferred_element_type=jnp.float32) + bqkv_ref[...]
    wo = wo_ref[...]                                          # (E, E) bf16
    y = jnp.zeros((T, E), jnp.float32) + bo_ref[...]
    for h in range(num_heads):
        q = qkv[:, h * hd:(h + 1) * hd].astype(jnp.bfloat16)
        k = qkv[:, E + h * hd:E + (h + 1) * hd].astype(jnp.bfloat16)
        v = qkv[:, 2 * E + h * hd:2 * E + (h + 1) * hd].astype(jnp.bfloat16)
        # contract last dims directly: no transposed copy of K
        s = lax.dot_general(q, k, (((1,), (1,)), ((), ())),
                            preferred_element_type=jnp.float32) * scale
        s = s - jnp.max(s, axis=-1, keepdims=True)
        p = jnp.exp(s)
        p = p * pl.reciprocal(jnp.sum(p, axis=-1, keepdims=True), approx=True)
        hv = jnp.dot(p.astype(jnp.bfloat16), v, preferred_element_type=jnp.float32)
        # fold the output projection into the head loop: no (T, E) head concat
        y = y + jnp.dot(hv.astype(jnp.bfloat16), wo[h * hd:(h + 1) * hd, :],
                        preferred_element_type=jnp.float32)
    o_ref[...] = y[None]


def attention(x, wqkv, bqkv, wo, bo, *, num_heads):
    B, T, E = x.shape
    scale = 1.0 / float(E // num_heads) ** 0.5
    est = 8 * T * T + 40 * T * E + 10 * E * E
    return pl.pallas_call(
        functools.partial(_attn_kernel, num_heads=num_heads, scale=scale),
        out_shape=jax.ShapeDtypeStruct((B, T, E), jnp.float32),
        grid=(B,),
        in_specs=[pl.BlockSpec((1, T, E), lambda b: (b, 0, 0)),
                  pl.BlockSpec(wqkv.shape, lambda b: (0, 0)),
                  pl.BlockSpec(bqkv.shape, lambda b: (0, 0)),
                  pl.BlockSpec(wo.shape, lambda b: (0, 0)),
                  pl.BlockSpec(bo.shape, lambda b: (0, 0))],
        out_specs=pl.BlockSpec((1, T, E), lambda b: (b, 0, 0)),
        compiler_params=_cparams(("parallel",), est),
    )(x, wqkv, bqkv, wo, bo)


# ----------------------------- fused tail MLP --------------------------------------

def _tail_kernel(g_ref, a_ref, wfg_ref, wfa_ref, bfu_ref, wp_ref, bp_ref,
                 wh_ref, bh_ref, wd_ref, bd_ref, o_ref):
    # attn_gru_fusion: concat([gru, attn]) @ W == gru @ W[:H2] + attn @ W[H2:]
    c = (jnp.dot(g_ref[...].astype(jnp.bfloat16), wfg_ref[...],
                 preferred_element_type=jnp.float32)
         + jnp.dot(a_ref[...].astype(jnp.bfloat16), wfa_ref[...],
                   preferred_element_type=jnp.float32)
         + bfu_ref[...])
    c = jnp.maximum(c, 0.0)
    p = jnp.maximum(jnp.dot(c.astype(jnp.bfloat16), wp_ref[...],
                            preferred_element_type=jnp.float32) + bp_ref[...], 0.0)
    xh = jnp.dot(p.astype(jnp.bfloat16), wh_ref[...],
                 preferred_element_type=jnp.float32) + bh_ref[...]
    o_ref[...] = jnp.dot(xh.astype(jnp.bfloat16), wd_ref[...],
                         preferred_element_type=jnp.float32) + bd_ref[...]


def tail_mlp(g, a, wfg, wfa, bfu, wp, bp, wh, bh, wd, bd):
    """g: [M, 2H], a: [M, E] -> [Mp, n_pad] f32 (rows padded to tile, caller slices)."""
    M = g.shape[0]
    n_pad = wd.shape[1]
    tm = 256 if M >= 256 else _round_up(M, 8)       # fixed tile; pad ragged rows
    Mp = _round_up(M, tm)
    if Mp != M:
        pad = ((0, Mp - M), (0, 0))
        g = jnp.pad(g, pad)
        a = jnp.pad(a, pad)

    def full(arr):
        return pl.BlockSpec(arr.shape, lambda i: (0, 0))

    est = 4 * tm * (g.shape[1] + a.shape[1] + 256 + 128 + 64 + n_pad)
    out = pl.pallas_call(
        _tail_kernel,
        out_shape=jax.ShapeDtypeStruct((Mp, n_pad), jnp.float32),
        grid=(Mp // tm,),
        in_specs=[pl.BlockSpec((tm, g.shape[1]), lambda i: (i, 0)),
                  pl.BlockSpec((tm, a.shape[1]), lambda i: (i, 0)),
                  full(wfg), full(wfa), full(bfu), full(wp), full(bp),
                  full(wh), full(bh), full(wd), full(bd)],
        out_specs=pl.BlockSpec((tm, n_pad), lambda i: (i, 0)),
        compiler_params=_cparams(("parallel",), est),
    )(g, a, wfg, wfa, bfu, wp, bp, wh, bh, wd, bd)
    return out[:M]


# ----------------------------- parameters -------------------------------------------

def init_params(key, n_mels, phoneme_dim, singer_dim, language_dim, hidden_dim, n_out):
    H = hidden_dim // 2
    fusion_in = 128 + 32 + phoneme_dim + singer_dim + language_dim
    ks = iter(jax.random.split(key, 48))

    def w(shape, fan_in):
        return jax.random.normal(next(ks), shape, jnp.float32) * (1.0 / jnp.sqrt(fan_in))

    def b(n):
        return jax.random.normal(next(ks), (n,), jnp.float32) * 0.01

    p = {}
    # weight_norm(Conv/Linear) at forward time == plain Conv/Linear with the effective
    # weight; we initialize effective weights directly (synthetic).
    p['mel_conv0_w'] = w((3, n_mels, 128), 3 * n_mels); p['mel_conv0_b'] = b(128)
    p['mel_conv1_w'] = w((3, 128, 128), 3 * 128);       p['mel_conv1_b'] = b(128)
    p['f0_conv_w'] = w((3, 1, 32), 3);                  p['f0_conv_b'] = b(32)
    p['fusion0_w'] = w((fusion_in, 256), fusion_in);    p['fusion0_b'] = b(256)
    p['fusion1_w'] = w((256, 256), 256);                p['fusion1_b'] = b(256)
    for layer in range(2):
        in_dim = 256   # layer 0 input 256 (fused); layer 1 input 2*H = 256
        for tag in ('', '_rev'):
            p[f'gru_wih_l{layer}{tag}'] = w((in_dim, 3 * H), in_dim)
            p[f'gru_whh_l{layer}{tag}'] = w((H, 3 * H), H)
            p[f'gru_bih_l{layer}{tag}'] = b(3 * H)
            p[f'gru_bhh_l{layer}{tag}'] = b(3 * H)
    E = 256
    p['attn_in_w'] = w((E, 3 * E), E);   p['attn_in_b'] = b(3 * E)
    p['attn_out_w'] = w((E, E), E);      p['attn_out_b'] = b(E)
    p['fuse_w'] = w((2 * hidden_dim, hidden_dim), 2 * hidden_dim); p['fuse_b'] = b(hidden_dim)
    p['pre_out_w'] = w((hidden_dim, 128), hidden_dim);             p['pre_out_b'] = b(128)
    p['pre_hid_w'] = w((128, 64), 128);                            p['pre_hid_b'] = b(64)
    p['dense_w'] = w((64, n_out), 64);                             p['dense_b'] = b(n_out)
    return p


# ----------------------------- forward pass ------------------------------------------

def feature_extractor_forward(params, mel, f0, phoneme_seq, singer_id, language_id,
                              output_splits, hidden_dim=256, num_heads=4):
    B, T, n_mels = mel.shape
    P = phoneme_seq.shape[-1]
    S = singer_id.shape[-1]
    H = hidden_dim // 2
    E = 256
    bf16 = lambda arr: arr.astype(jnp.bfloat16)   # MXU operands in bf16, accumulate f32

    # ---- frontend: mel/f0 conv stacks + fusion MLP (single fused kernel) ----
    w0 = params['fusion0_w']
    o0, o1, o2, o3 = 128, 160, 160 + P, 160 + P + S
    fused = frontend(
        mel, f0[..., None], phoneme_seq, singer_id[:, None, :], language_id[:, None, :],
        bf16(params['mel_conv0_w']), params['mel_conv0_b'].reshape(1, 128),
        bf16(params['mel_conv1_w']), params['mel_conv1_b'].reshape(1, 128),
        params['f0_conv_w'], params['f0_conv_b'].reshape(1, 32),
        bf16(w0[:o0]), bf16(w0[o0:o1]), bf16(w0[o1:o2]), bf16(w0[o2:o3]), bf16(w0[o3:]),
        params['fusion0_b'].reshape(1, E),
        bf16(params['fusion1_w']), params['fusion1_b'].reshape(1, E))      # [B, T, 256]

    # ---- 2-layer bidirectional GRU (both directions interleaved, input proj fused) ----
    gru_in = fused
    for layer in range(2):
        wih = jnp.concatenate([params[f'gru_wih_l{layer}'],
                               params[f'gru_wih_l{layer}_rev']], axis=1)    # (in, 6H)
        bih = jnp.concatenate([params[f'gru_bih_l{layer}'],
                               params[f'gru_bih_l{layer}_rev']], axis=0)    # (6H,)
        whh = jnp.concatenate([params[f'gru_whh_l{layer}'],
                               params[f'gru_whh_l{layer}_rev']], axis=1)    # (H, 6H)
        bhh = jnp.concatenate([params[f'gru_bhh_l{layer}'],
                               params[f'gru_bhh_l{layer}_rev']], axis=0)    # (6H,)
        gru_in = gru_bidir(gru_in, bf16(wih), bih.reshape(1, 6 * H),
                           bf16(whh), bhh.reshape(1, 6 * H))                # [B, T, 2H]
    gru_out = gru_in

    # ---- multi-head self-attention on `fused` (QKV + softmax + out proj fused) ----
    attn_out = attention(fused,
                         bf16(params['attn_in_w']), params['attn_in_b'].reshape(1, 3 * E),
                         bf16(params['attn_out_w']), params['attn_out_b'].reshape(1, E),
                         num_heads=num_heads)                               # [B, T, E]

    # ---- fused tail: attn_gru_fusion -> pre_out -> pre_out_to_hidden -> dense_out ----
    fw = params['fuse_w']
    n_out = params['dense_w'].shape[1]
    n_pad = _round_up(max(n_out, 128), 128)       # lane-dense final store
    wd = jnp.pad(params['dense_w'], ((0, 0), (0, n_pad - n_out)))
    bd = jnp.pad(params['dense_b'], (0, n_pad - n_out))
    e = tail_mlp(gru_out.reshape(B * T, hidden_dim), attn_out.reshape(B * T, E),
                 bf16(fw[:hidden_dim]), bf16(fw[hidden_dim:]),
                 params['fuse_b'].reshape(1, hidden_dim),
                 bf16(params['pre_out_w']), params['pre_out_b'].reshape(1, 128),
                 bf16(params['pre_hid_w']), params['pre_hid_b'].reshape(1, 64),
                 bf16(wd), bd.reshape(1, n_pad))
    e = e[:, :n_out].reshape(B, T, n_out)

    # split_to_dict
    controls = {}
    off = 0
    for name, size in output_splits.items():
        controls[name] = e[..., off:off + size]
        off += size
    return controls


# ----------------------------- main ---------------------------------------------------

if __name__ == "__main__":
    B, T = 2, 16
    n_mels = 8
    phoneme_dim, singer_dim, language_dim = 128, 16, 8
    hidden_dim, num_heads = 256, 4
    output_splits = {"amplitude": 8, "harmonic": 32, "noise": 16}
    n_out = sum(output_splits.values())

    key = jax.random.PRNGKey(0)
    kp, km, kf, kph, ksg, kl = jax.random.split(key, 6)
    params = init_params(kp, n_mels, phoneme_dim, singer_dim, language_dim,
                         hidden_dim, n_out)

    mel = jax.random.normal(km, (B, T, n_mels), jnp.float32)
    f0 = jax.random.normal(kf, (B, T), jnp.float32)
    phoneme_seq = jax.random.normal(kph, (B, T, phoneme_dim), jnp.float32)
    singer_id = jax.random.normal(ksg, (B, singer_dim), jnp.float32)
    language_id = jax.random.normal(kl, (B, language_dim), jnp.float32)

    controls = feature_extractor_forward(params, mel, f0, phoneme_seq, singer_id,
                                         language_id, output_splits,
                                         hidden_dim=hidden_dim, num_heads=num_heads)
    for name, size in output_splits.items():
        arr = jax.block_until_ready(controls[name])
        assert arr.shape == (B, T, size), (name, arr.shape)
    print("KERNEL_OK")
</pallas_src>

<mosaic_0001>
module attributes {stable_mosaic.version = 11 : i64} {
  func.func @_frontend_kernel(%arg0: i32, %arg1: memref<1x16x8xf32, #tpu.memory_space<vmem>>, %arg2: memref<1x16x1xf32, #tpu.memory_space<vmem>>, %arg3: memref<1x16x128xf32, #tpu.memory_space<vmem>>, %arg4: memref<1x1x16xf32, #tpu.memory_space<vmem>>, %arg5: memref<1x1x8xf32, #tpu.memory_space<vmem>>, %arg6: memref<3x8x128xbf16, #tpu.memory_space<vmem>>, %arg7: memref<1x128xf32, #tpu.memory_space<vmem>>, %arg8: memref<3x128x128xbf16, #tpu.memory_space<vmem>>, %arg9: memref<1x128xf32, #tpu.memory_space<vmem>>, %arg10: memref<3x1x32xf32, #tpu.memory_space<vmem>>, %arg11: memref<1x32xf32, #tpu.memory_space<vmem>>, %arg12: memref<128x256xbf16, #tpu.memory_space<vmem>>, %arg13: memref<32x256xbf16, #tpu.memory_space<vmem>>, %arg14: memref<128x256xbf16, #tpu.memory_space<vmem>>, %arg15: memref<16x256xbf16, #tpu.memory_space<vmem>>, %arg16: memref<8x256xbf16, #tpu.memory_space<vmem>>, %arg17: memref<1x256xf32, #tpu.memory_space<vmem>>, %arg18: memref<256x256xbf16, #tpu.memory_space<vmem>>, %arg19: memref<1x256xf32, #tpu.memory_space<vmem>>, %arg20: memref<1x16x256xf32, #tpu.memory_space<vmem>>) attributes {dimension_semantics = [#tpu.dimension_semantics<parallel>], iteration_bounds = array<i64: 2>, scalar_prefetch = 0 : i64, scratch_operands = 0 : i64, tpu.core_type = #tpu.core_type<tc>, window_params = [{transform_indices = @transform_0, window_bounds = array<i64: 1, 16, 8>}, {transform_indices = @transform_1, window_bounds = array<i64: 1, 16, 1>}, {transform_indices = @transform_2, window_bounds = array<i64: 1, 16, 128>}, {transform_indices = @transform_3, window_bounds = array<i64: 1, 1, 16>}, {transform_indices = @transform_4, window_bounds = array<i64: 1, 1, 8>}, {pipeline_mode = #tpu.pipeline_mode<synchronous>, transform_indices = @transform_5, window_bounds = array<i64: 3, 8, 128>}, {pipeline_mode = #tpu.pipeline_mode<synchronous>, transform_indices = @transform_6, window_bounds = array<i64: 1, 128>}, {pipeline_mode = #tpu.pipeline_mode<synchronous>, transform_indices = @transform_7, window_bounds = array<i64: 3, 128, 128>}, {pipeline_mode = #tpu.pipeline_mode<synchronous>, transform_indices = @transform_8, window_bounds = array<i64: 1, 128>}, {pipeline_mode = #tpu.pipeline_mode<synchronous>, transform_indices = @transform_9, window_bounds = array<i64: 3, 1, 32>}, {pipeline_mode = #tpu.pipeline_mode<synchronous>, transform_indices = @transform_10, window_bounds = array<i64: 1, 32>}, {pipeline_mode = #tpu.pipeline_mode<synchronous>, transform_indices = @transform_11, window_bounds = array<i64: 128, 256>}, {pipeline_mode = #tpu.pipeline_mode<synchronous>, transform_indices = @transform_12, window_bounds = array<i64: 32, 256>}, {pipeline_mode = #tpu.pipeline_mode<synchronous>, transform_indices = @transform_13, window_bounds = array<i64: 128, 256>}, {pipeline_mode = #tpu.pipeline_mode<synchronous>, transform_indices = @transform_14, window_bounds = array<i64: 16, 256>}, {pipeline_mode = #tpu.pipeline_mode<synchronous>, transform_indices = @transform_15, window_bounds = array<i64: 8, 256>}, {pipeline_mode = #tpu.pipeline_mode<synchronous>, transform_indices = @transform_16, window_bounds = array<i64: 1, 256>}, {pipeline_mode = #tpu.pipeline_mode<synchronous>, transform_indices = @transform_17, window_bounds = array<i64: 256, 256>}, {pipeline_mode = #tpu.pipeline_mode<synchronous>, transform_indices = @transform_18, window_bounds = array<i64: 1, 256>}, {transform_indices = @transform_19, window_bounds = array<i64: 1, 16, 256>}]} {
    %c0 = arith.constant 0 : index
    %c0_0 = arith.constant 0 : index
    %c0_1 = arith.constant 0 : index
    %0 = vector.load %arg1[%c0, %c0_0, %c0_1] : memref<1x16x8xf32, #tpu.memory_space<vmem>>, vector<1x16x8xf32>
    %1 = vector.shape_cast %0 : vector<1x16x8xf32> to vector<16x8xf32>
    %c0_2 = arith.constant 0 : index
    %c0_3 = arith.constant 0 : index
    %c0_4 = arith.constant 0 : index
    %2 = vector.load %arg6[%c0_2, %c0_3, %c0_4] : memref<3x8x128xbf16, #tpu.memory_space<vmem>>, vector<3x8x128xbf16>
    %c0_5 = arith.constant 0 : index
    %c0_6 = arith.constant 0 : index
    %3 = vector.load %arg7[%c0_5, %c0_6] : memref<1x128xf32, #tpu.memory_space<vmem>>, vector<1x128xf32>
    %4 = arith.truncf %1 : vector<16x8xf32> to vector<16x8xbf16>
    %5 = vector.extract_strided_slice %2 {offsets = [0, 0, 0], sizes = [1, 8, 128], strides = [1, 1, 1]} : vector<3x8x128xbf16> to vector<1x8x128xbf16>
    %6 = vector.shape_cast %5 : vector<1x8x128xbf16> to vector<8x128xbf16>
    %cst = arith.constant dense<0.000000e+00> : vector<16x128xf32>
    %7 = tpu.matmul %4, %6, %cst {dimension_numbers = #tpu.dot_dimension_numbers<[1], [0], [0], [1], [0, 0, 1, 1], [], []>} : vector<16x8xbf16>, vector<8x128xbf16>, vector<16x128xf32> -> vector<16x128xf32>
    %8 = vector.extract_strided_slice %2 {offsets = [1, 0, 0], sizes = [1, 8, 128], strides = [1, 1, 1]} : vector<3x8x128xbf16> to vector<1x8x128xbf16>
    %9 = vector.shape_cast %8 : vector<1x8x128xbf16> to vector<8x128xbf16>
    %cst_7 = arith.constant dense<0.000000e+00> : vector<16x128xf32>
    %10 = tpu.matmul %4, %9, %cst_7 {dimension_numbers = #tpu.dot_dimension_numbers<[1], [0], [0], [1], [0, 0, 1, 1], [], []>} : vector<16x8xbf16>, vector<8x128xbf16>, vector<16x128xf32> -> vector<16x128xf32>
    %11 = vector.extract_strided_slice %2 {offsets = [2, 0, 0], sizes = [1, 8, 128], strides = [1, 1, 1]} : vector<3x8x128xbf16> to vector<1x8x128xbf16>
    %12 = vector.shape_cast %11 : vector<1x8x128xbf16> to vector<8x128xbf16>
    %cst_8 = arith.constant dense<0.000000e+00> : vector<16x128xf32>
    %13 = tpu.matmul %4, %12, %cst_8 {dimension_numbers = #tpu.dot_dimension_numbers<[1], [0], [0], [1], [0, 0, 1, 1], [], []>} : vector<16x8xbf16>, vector<8x128xbf16>, vector<16x128xf32> -> vector<16x128xf32>
    %14 = tpu.iota {dimensions = array<i32: 0>} : vector<16x128xi32>
    %c0_i32 = arith.constant 0 : i32
    %15 = vector.broadcast %c0_i32 : i32 to vector<16x128xi32>
    %16 = arith.cmpi eq, %14, %15 : vector<16x128xi32>
    %c1_i32 = arith.constant 1 : i32
    %17 = tpu.dynamic_rotate %7 by %c1_i32 dim 0 : vector<16x128xf32>, i32 -> vector<16x128xf32>
    %cst_9 = arith.constant 0.000000e+00 : f32
    %18 = vector.broadcast %cst_9 : f32 to vector<16x128xf32>
    %19 = arith.select %16, %18, %17 : vector<16x128xi1>, vector<16x128xf32>
    %c15_i32 = arith.constant 15 : i32
    %20 = vector.broadcast %c15_i32 : i32 to vector<16x128xi32>
    %21 = arith.cmpi eq, %14, %20 : vector<16x128xi32>
    %c15_i32_10 = arith.constant 15 : i32
    %22 = tpu.dynamic_rotate %13 by %c15_i32_10 dim 0 : vector<16x128xf32>, i32 -> vector<16x128xf32>
    %cst_11 = arith.constant 0.000000e+00 : f32
    %23 = vector.broadcast %cst_11 : f32 to vector<16x128xf32>
    %24 = arith.select %21, %23, %22 : vector<16x128xi1>, vector<16x128xf32>
    %25 = arith.addf %19, %10 : vector<16x128xf32>
    %26 = arith.addf %25, %24 : vector<16x128xf32>
    %27 = vector.broadcast %3 : vector<1x128xf32> to vector<16x128xf32>
    %28 = arith.addf %26, %27 : vector<16x128xf32>
    %cst_12 = arith.constant 0.000000e+00 : f32
    %29 = vector.broadcast %cst_12 : f32 to vector<16x128xf32>
    %30 = arith.maximumf %28, %29 : vector<16x128xf32>
    %c0_13 = arith.constant 0 : index
    %c0_14 = arith.constant 0 : index
    %c0_15 = arith.constant 0 : index
    %31 = vector.load %arg8[%c0_13, %c0_14, %c0_15] : memref<3x128x128xbf16, #tpu.memory_space<vmem>>, vector<3x128x128xbf16>
    %c0_16 = arith.constant 0 : index
    %c0_17 = arith.constant 0 : index
    %32 = vector.load %arg9[%c0_16, %c0_17] : memref<1x128xf32, #tpu.memory_space<vmem>>, vector<1x128xf32>
    %33 = arith.truncf %30 : vector<16x128xf32> to vector<16x128xbf16>
    %34 = vector.extract_strided_slice %31 {offsets = [0, 0, 0], sizes = [1, 128, 128], strides = [1, 1, 1]} : vector<3x128x128xbf16> to vector<1x128x128xbf16>
    %35 = vector.shape_cast %34 : vector<1x128x128xbf16> to vector<128x128xbf16>
    %cst_18 = arith.constant dense<0.000000e+00> : vector<16x128xf32>
    %36 = tpu.matmul %33, %35, %cst_18 {dimension_numbers = #tpu.dot_dimension_numbers<[1], [0], [0], [1], [0, 0, 1, 1], [], []>} : vector<16x128xbf16>, vector<128x128xbf16>, vector<16x128xf32> -> vector<16x128xf32>
    %37 = vector.extract_strided_slice %31 {offsets = [1, 0, 0], sizes = [1, 128, 128], strides = [1, 1, 1]} : vector<3x128x128xbf16> to vector<1x128x128xbf16>
    %38 = vector.shape_cast %37 : vector<1x128x128xbf16> to vector<128x128xbf16>
    %cst_19 = arith.constant dense<0.000000e+00> : vector<16x128xf32>
    %39 = tpu.matmul %33, %38, %cst_19 {dimension_numbers = #tpu.dot_dimension_numbers<[1], [0], [0], [1], [0, 0, 1, 1], [], []>} : vector<16x128xbf16>, vector<128x128xbf16>, vector<16x128xf32> -> vector<16x128xf32>
    %40 = vector.extract_strided_slice %31 {offsets = [2, 0, 0], sizes = [1, 128, 128], strides = [1, 1, 1]} : vector<3x128x128xbf16> to vector<1x128x128xbf16>
    %41 = vector.shape_cast %40 : vector<1x128x128xbf16> to vector<128x128xbf16>
    %cst_20 = arith.constant dense<0.000000e+00> : vector<16x128xf32>
    %42 = tpu.matmul %33, %41, %cst_20 {dimension_numbers = #tpu.dot_dimension_numbers<[1], [0], [0], [1], [0, 0, 1, 1], [], []>} : vector<16x128xbf16>, vector<128x128xbf16>, vector<16x128xf32> -> vector<16x128xf32>
    %43 = tpu.iota {dimensions = array<i32: 0>} : vector<16x128xi32>
    %c0_i32_21 = arith.constant 0 : i32
    %44 = vector.broadcast %c0_i32_21 : i32 to vector<16x128xi32>
    %45 = arith.cmpi eq, %43, %44 : vector<16x128xi32>
    %c1_i32_22 = arith.constant 1 : i32
    %46 = tpu.dynamic_rotate %36 by %c1_i32_22 dim 0 : vector<16x128xf32>, i32 -> vector<16x128xf32>
    %cst_23 = arith.constant 0.000000e+00 : f32
    %47 = vector.broadcast %cst_23 : f32 to vector<16x128xf32>
    %48 = arith.select %45, %47, %46 : vector<16x128xi1>, vector<16x128xf32>
    %c15_i32_24 = arith.constant 15 : i32
    %49 = vector.broadcast %c15_i32_24 : i32 to vector<16x128xi32>
    %50 = arith.cmpi eq, %43, %49 : vector<16x128xi32>
    %c15_i32_25 = arith.constant 15 : i32
    %51 = tpu.dynamic_rotate %42 by %c15_i32_25 dim 0 : vector<16x128xf32>, i32 -> vector<16x128xf32>
    %cst_26 = arith.constant 0.000000e+00 : f32
    %52 = vector.broadcast %cst_26 : f32 to vector<16x128xf32>
    %53 = arith.select %50, %52, %51 : vector<16x128xi1>, vector<16x128xf32>
    %54 = arith.addf %48, %39 : vector<16x128xf32>
    %55 = arith.addf %54, %53 : vector<16x128xf32>
    %56 = vector.broadcast %32 : vector<1x128xf32> to vector<16x128xf32>
    %57 = arith.addf %55, %56 : vector<16x128xf32>
    %cst_27 = arith.constant 0.000000e+00 : f32
    %58 = vector.broadcast %cst_27 : f32 to vector<16x128xf32>
    %59 = arith.maximumf %57, %58 : vector<16x128xf32>
    %c0_28 = arith.constant 0 : index
    %c0_29 = arith.constant 0 : index
    %c0_30 = arith.constant 0 : index
    %60 = vector.load %arg2[%c0_28, %c0_29, %c0_30] : memref<1x16x1xf32, #tpu.memory_space<vmem>>, vector<1x16x1xf32>
    %61 = vector.shape_cast %60 : vector<1x16x1xf32> to vector<16x1xf32>
    %c0_31 = arith.constant 0 : index
    %c0_32 = arith.constant 0 : index
    %c0_33 = arith.constant 0 : index
    %62 = vector.load %arg10[%c0_31, %c0_32, %c0_33] : memref<3x1x32xf32, #tpu.memory_space<vmem>>, vector<3x1x32xf32>
    %63 = vector.extract_strided_slice %62 {offsets = [0, 0, 0], sizes = [1, 1, 32], strides = [1, 1, 1]} : vector<3x1x32xf32> to vector<1x1x32xf32>
    %64 = vector.shape_cast %63 : vector<1x1x32xf32> to vector<1x32xf32>
    %65 = vector.broadcast %61 : vector<16x1xf32> to vector<16x32xf32>
    %66 = vector.broadcast %64 : vector<1x32xf32> to vector<16x32xf32>
    %67 = arith.mulf %65, %66 : vector<16x32xf32>
    %68 = vector.extract_strided_slice %62 {offsets = [1, 0, 0], sizes = [1, 1, 32], strides = [1, 1, 1]} : vector<3x1x32xf32> to vector<1x1x32xf32>
    %69 = vector.shape_cast %68 : vector<1x1x32xf32> to vector<1x32xf32>
    %70 = vector.broadcast %61 : vector<16x1xf32> to vector<16x32xf32>
    %71 = vector.broadcast %69 : vector<1x32xf32> to vector<16x32xf32>
    %72 = arith.mulf %70, %71 : vector<16x32xf32>
    %73 = vector.extract_strided_slice %62 {offsets = [2, 0, 0], sizes = [1, 1, 32], strides = [1, 1, 1]} : vector<3x1x32xf32> to vector<1x1x32xf32>
    %74 = vector.shape_cast %73 : vector<1x1x32xf32> to vector<1x32xf32>
    %75 = vector.broadcast %61 : vector<16x1xf32> to vector<16x32xf32>
    %76 = vector.broadcast %74 : vector<1x32xf32> to vector<16x32xf32>
    %77 = arith.mulf %75, %76 : vector<16x32xf32>
    %78 = tpu.iota {dimensions = array<i32: 0>} : vector<16x32xi32>
    %c0_i32_34 = arith.constant 0 : i32
    %79 = vector.broadcast %c0_i32_34 : i32 to vector<16x32xi32>
    %80 = arith.cmpi eq, %78, %79 : vector<16x32xi32>
    %c1_i32_35 = arith.constant 1 : i32
    %81 = tpu.dynamic_rotate %67 by %c1_i32_35 dim 0 : vector<16x32xf32>, i32 -> vector<16x32xf32>
    %cst_36 = arith.constant 0.000000e+00 : f32
    %82 = vector.broadcast %cst_36 : f32 to vector<16x32xf32>
    %83 = arith.select %80, %82, %81 : vector<16x32xi1>, vector<16x32xf32>
    %c15_i32_37 = arith.constant 15 : i32
    %84 = vector.broadcast %c15_i32_37 : i32 to vector<16x32xi32>
    %85 = arith.cmpi eq, %78, %84 : vector<16x32xi32>
    %c15_i32_38 = arith.constant 15 : i32
    %86 = tpu.dynamic_rotate %77 by %c15_i32_38 dim 0 : vector<16x32xf32>, i32 -> vector<16x32xf32>
    %cst_39 = arith.constant 0.000000e+00 : f32
    %87 = vector.broadcast %cst_39 : f32 to vector<16x32xf32>
    %88 = arith.select %85, %87, %86 : vector<16x32xi1>, vector<16x32xf32>
    %89 = arith.addf %83, %72 : vector<16x32xf32>
    %90 = arith.addf %89, %88 : vector<16x32xf32>
    %c0_40 = arith.constant 0 : index
    %c0_41 = arith.constant 0 : index
    %91 = vector.load %arg11[%c0_40, %c0_41] : memref<1x32xf32, #tpu.memory_space<vmem>>, vector<1x32xf32>
    %92 = vector.broadcast %91 : vector<1x32xf32> to vector<16x32xf32>
    %93 = arith.addf %90, %92 : vector<16x32xf32>
    %cst_42 = arith.constant 0.000000e+00 : f32
    %94 = vector.broadcast %cst_42 : f32 to vector<16x32xf32>
    %95 = arith.maximumf %93, %94 : vector<16x32xf32>
    %c0_43 = arith.constant 0 : index
    %c0_44 = arith.constant 0 : index
    %c0_45 = arith.constant 0 : index
    %96 = vector.load %arg4[%c0_43, %c0_44, %c0_45] : memref<1x1x16xf32, #tpu.memory_space<vmem>>, vector<1x1x16xf32>
    %97 = vector.shape_cast %96 : vector<1x1x16xf32> to vector<1x16xf32>
    %98 = arith.truncf %97 : vector<1x16xf32> to vector<1x16xbf16>
    %c0_46 = arith.constant 0 : index
    %c0_47 = arith.constant 0 : index
    %99 = vector.load %arg15[%c0_46, %c0_47] : memref<16x256xbf16, #tpu.memory_space<vmem>>, vector<16x256xbf16>
    %cst_48 = arith.constant dense<0.000000e+00> : vector<1x256xf32>
    %100 = tpu.matmul %98, %99, %cst_48 {dimension_numbers = #tpu.dot_dimension_numbers<[1], [0], [0], [1], [0, 0, 1, 1], [], []>} : vector<1x16xbf16>, vector<16x256xbf16>, vector<1x256xf32> -> vector<1x256xf32>
    %c0_49 = arith.constant 0 : index
    %c0_50 = arith.constant 0 : index
    %c0_51 = arith.constant 0 : index
    %101 = vector.load %arg5[%c0_49, %c0_50, %c0_51] : memref<1x1x8xf32, #tpu.memory_space<vmem>>, vector<1x1x8xf32>
    %102 = vector.shape_cast %101 : vector<1x1x8xf32> to vector<1x8xf32>
    %103 = arith.truncf %102 : vector<1x8xf32> to vector<1x8xbf16>
    %c0_52 = arith.constant 0 : index
    %c0_53 = arith.constant 0 : index
    %104 = vector.load %arg16[%c0_52, %c0_53] : memref<8x256xbf16, #tpu.memory_space<vmem>>, vector<8x256xbf16>
    %cst_54 = arith.constant dense<0.000000e+00> : vector<1x256xf32>
    %105 = tpu.matmul %103, %104, %cst_54 {dimension_numbers = #tpu.dot_dimension_numbers<[1], [0], [0], [1], [0, 0, 1, 1], [], []>} : vector<1x8xbf16>, vector<8x256xbf16>, vector<1x256xf32> -> vector<1x256xf32>
    %106 = arith.addf %100, %105 : vector<1x256xf32>
    %c0_55 = arith.constant 0 : index
    %c0_56 = arith.constant 0 : index
    %107 = vector.load %arg17[%c0_55, %c0_56] : memref<1x256xf32, #tpu.memory_space<vmem>>, vector<1x256xf32>
    %108 = arith.addf %106, %107 : vector<1x256xf32>
    %109 = arith.truncf %59 : vector<16x128xf32> to vector<16x128xbf16>
    %c0_57 = arith.constant 0 : index
    %c0_58 = arith.constant 0 : index
    %110 = vector.load %arg12[%c0_57, %c0_58] : memref<128x256xbf16, #tpu.memory_space<vmem>>, vector<128x256xbf16>
    %cst_59 = arith.constant dense<0.000000e+00> : vector<16x256xf32>
    %111 = tpu.matmul %109, %110, %cst_59 {dimension_numbers = #tpu.dot_dimension_numbers<[1], [0], [0], [1], [0, 0, 1, 1], [], []>} : vector<16x128xbf16>, vector<128x256xbf16>, vector<16x256xf32> -> vector<16x256xf32>
    %112 = arith.truncf %95 : vector<16x32xf32> to vector<16x32xbf16>
    %c0_60 = arith.constant 0 : index
    %c0_61 = arith.constant 0 : index
    %113 = vector.load %arg13[%c0_60, %c0_61] : memref<32x256xbf16, #tpu.memory_space<vmem>>, vector<32x256xbf16>
    %cst_62 = arith.constant dense<0.000000e+00> : vector<16x256xf32>
    %114 = tpu.matmul %112, %113, %cst_62 {dimension_numbers = #tpu.dot_dimension_numbers<[1], [0], [0], [1], [0, 0, 1, 1], [], []>} : vector<16x32xbf16>, vector<32x256xbf16>, vector<16x256xf32> -> vector<16x256xf32>
    %115 = arith.addf %111, %114 : vector<16x256xf32>
    %c0_63 = arith.constant 0 : index
    %c0_64 = arith.constant 0 : index
    %c0_65 = arith.constant 0 : index
    %116 = vector.load %arg3[%c0_63, %c0_64, %c0_65] : memref<1x16x128xf32, #tpu.memory_space<vmem>>, vector<1x16x128xf32>
    %117 = vector.shape_cast %116 : vector<1x16x128xf32> to vector<16x128xf32>
    %118 = arith.truncf %117 : vector<16x128xf32> to vector<16x128xbf16>
    %c0_66 = arith.constant 0 : index
    %c0_67 = arith.constant 0 : index
    %119 = vector.load %arg14[%c0_66, %c0_67] : memref<128x256xbf16, #tpu.memory_space<vmem>>, vector<128x256xbf16>
    %cst_68 = arith.constant dense<0.000000e+00> : vector<16x256xf32>
    %120 = tpu.matmul %118, %119, %cst_68 {dimension_numbers = #tpu.dot_dimension_numbers<[1], [0], [0], [1], [0, 0, 1, 1], [], []>} : vector<16x128xbf16>, vector<128x256xbf16>, vector<16x256xf32> -> vector<16x256xf32>
    %121 = arith.addf %115, %120 : vector<16x256xf32>
    %122 = vector.broadcast %108 : vector<1x256xf32> to vector<16x256xf32>
    %123 = arith.addf %121, %122 : vector<16x256xf32>
    %cst_69 = arith.constant 0.000000e+00 : f32
    %124 = vector.broadcast %cst_69 : f32 to vector<16x256xf32>
    %125 = arith.maximumf %123, %124 : vector<16x256xf32>
    %126 = arith.truncf %125 : vector<16x256xf32> to vector<16x256xbf16>
    %c0_70 = arith.constant 0 : index
    %c0_71 = arith.constant 0 : index
    %127 = vector.load %arg18[%c0_70, %c0_71] : memref<256x256xbf16, #tpu.memory_space<vmem>>, vector<256x256xbf16>
    %cst_72 = arith.constant dense<0.000000e+00> : vector<16x256xf32>
    %128 = tpu.matmul %126, %127, %cst_72 {dimension_numbers = #tpu.dot_dimension_numbers<[1], [0], [0], [1], [0, 0, 1, 1], [], []>} : vector<16x256xbf16>, vector<256x256xbf16>, vector<16x256xf32> -> vector<16x256xf32>
    %c0_73 = arith.constant 0 : index
    %c0_74 = arith.constant 0 : index
    %129 = vector.load %arg19[%c0_73, %c0_74] : memref<1x256xf32, #tpu.memory_space<vmem>>, vector<1x256xf32>
    %130 = vector.broadcast %129 : vector<1x256xf32> to vector<16x256xf32>
    %131 = arith.addf %128, %130 : vector<16x256xf32>
    %cst_75 = arith.constant 0.000000e+00 : f32
    %132 = vector.broadcast %cst_75 : f32 to vector<16x256xf32>
    %133 = arith.maximumf %131, %132 : vector<16x256xf32>
    %134 = vector.shape_cast %133 : vector<16x256xf32> to vector<1x16x256xf32>
    %c0_76 = arith.constant 0 : index
    %c0_77 = arith.constant 0 : index
    %c0_78 = arith.constant 0 : index
    %135 = vector.load %arg20[%c0_76, %c0_77, %c0_78] : memref<1x16x256xf32, #tpu.memory_space<vmem>>, vector<1x16x256xf32>
    tpu.vector_store %arg20[%c0_76, %c0_77, %c0_78], %134 {strides = array<i32>} : memref<1x16x256xf32, #tpu.memory_space<vmem>>, vector<1x16x256xf32>,
    return
  }
  func.func @transform_0(%arg0: i32) -> (i32, i32, i32) {
    %c0_i32 = arith.constant 0 : i32
    %c0_i32_0 = arith.constant 0 : i32
    %c0_i32_1 = arith.constant 0 : i32
    return %arg0, %c0_i32, %c0_i32_0 : i32, i32, i32
  }
  func.func @transform_1(%arg0: i32) -> (i32, i32, i32) {
    %c0_i32 = arith.constant 0 : i32
    %c0_i32_0 = arith.constant 0 : i32
    %c0_i32_1 = arith.constant 0 : i32
    return %arg0, %c0_i32, %c0_i32_0 : i32, i32, i32
  }
  func.func @transform_2(%arg0: i32) -> (i32, i32, i32) {
    %c0_i32 = arith.constant 0 : i32
    %c0_i32_0 = arith.constant 0 : i32
    %c0_i32_1 = arith.constant 0 : i32
    return %arg0, %c0_i32, %c0_i32_0 : i32, i32, i32
  }
  func.func @transform_3(%arg0: i32) -> (i32, i32, i32) {
    %c0_i32 = arith.constant 0 : i32
    %c0_i32_0 = arith.constant 0 : i32
    %c0_i32_1 = arith.constant 0 : i32
    return %arg0, %c0_i32, %c0_i32_0 : i32, i32, i32
  }
  func.func @transform_4(%arg0: i32) -> (i32, i32, i32) {
    %c0_i32 = arith.constant 0 : i32
    %c0_i32_0 = arith.constant 0 : i32
    %c0_i32_1 = arith.constant 0 : i32
    return %arg0, %c0_i32, %c0_i32_0 : i32, i32, i32
  }
  func.func @transform_5(%arg0: i32) -> (i32, i32, i32) {
    %c0_i32 = arith.constant 0 : i32
    %c0_i32_0 = arith.constant 0 : i32
    %c0_i32_1 = arith.constant 0 : i32
    %c0_i32_2 = arith.constant 0 : i32
    return %c0_i32, %c0_i32_0, %c0_i32_1 : i32, i32, i32
  }
  func.func @transform_6(%arg0: i32) -> (i32, i32) {
    %c0_i32 = arith.constant 0 : i32
    %c0_i32_0 = arith.constant 0 : i32
    %c0_i32_1 = arith.constant 0 : i32
    return %c0_i32, %c0_i32_0 : i32, i32
  }
  func.func @transform_7(%arg0: i32) -> (i32, i32, i32) {
    %c0_i32 = arith.constant 0 : i32
    %c0_i32_0 = arith.constant 0 : i32
    %c0_i32_1 = arith.constant 0 : i32
    %c0_i32_2 = arith.constant 0 : i32
    return %c0_i32, %c0_i32_0, %c0_i32_1 : i32, i32, i32
  }
  func.func @transform_8(%arg0: i32) -> (i32, i32) {
    %c0_i32 = arith.constant 0 : i32
    %c0_i32_0 = arith.constant 0 : i32
    %c0_i32_1 = arith.constant 0 : i32
    return %c0_i32, %c0_i32_0 : i32, i32
  }
  func.func @transform_9(%arg0: i32) -> (i32, i32, i32) {
    %c0_i32 = arith.constant 0 : i32
    %c0_i32_0 = arith.constant 0 : i32
    %c0_i32_1 = arith.constant 0 : i32
    %c0_i32_2 = arith.constant 0 : i32
    return %c0_i32, %c0_i32_0, %c0_i32_1 : i32, i32, i32
  }
  func.func @transform_10(%arg0: i32) -> (i32, i32) {
    %c0_i32 = arith.constant 0 : i32
    %c0_i32_0 = arith.constant 0 : i32
    %c0_i32_1 = arith.constant 0 : i32
    return %c0_i32, %c0_i32_0 : i32, i32
  }
  func.func @transform_11(%arg0: i32) -> (i32, i32) {
    %c0_i32 = arith.constant 0 : i32
    %c0_i32_0 = arith.constant 0 : i32
    %c0_i32_1 = arith.constant 0 : i32
    return %c0_i32, %c0_i32_0 : i32, i32
  }
  func.func @transform_12(%arg0: i32) -> (i32, i32) {
    %c0_i32 = arith.constant 0 : i32
    %c0_i32_0 = arith.constant 0 : i32
    %c0_i32_1 = arith.constant 0 : i32
    return %c0_i32, %c0_i32_0 : i32, i32
  }
  func.func @transform_13(%arg0: i32) -> (i32, i32) {
    %c0_i32 = arith.constant 0 : i32
    %c0_i32_0 = arith.constant 0 : i32
    %c0_i32_1 = arith.constant 0 : i32
    return %c0_i32, %c0_i32_0 : i32, i32
  }
  func.func @transform_14(%arg0: i32) -> (i32, i32) {
    %c0_i32 = arith.constant 0 : i32
    %c0_i32_0 = arith.constant 0 : i32
    %c0_i32_1 = arith.constant 0 : i32
    return %c0_i32, %c0_i32_0 : i32, i32
  }
  func.func @transform_15(%arg0: i32) -> (i32, i32) {
    %c0_i32 = arith.constant 0 : i32
    %c0_i32_0 = arith.constant 0 : i32
    %c0_i32_1 = arith.constant 0 : i32
    return %c0_i32, %c0_i32_0 : i32, i32
  }
  func.func @transform_16(%arg0: i32) -> (i32, i32) {
    %c0_i32 = arith.constant 0 : i32
    %c0_i32_0 = arith.constant 0 : i32
    %c0_i32_1 = arith.constant 0 : i32
    return %c0_i32, %c0_i32_0 : i32, i32
  }
  func.func @transform_17(%arg0: i32) -> (i32, i32) {
    %c0_i32 = arith.constant 0 : i32
    %c0_i32_0 = arith.constant 0 : i32
    %c0_i32_1 = arith.constant 0 : i32
    return %c0_i32, %c0_i32_0 : i32, i32
  }
  func.func @transform_18(%arg0: i32) -> (i32, i32) {
    %c0_i32 = arith.constant 0 : i32
    %c0_i32_0 = arith.constant 0 : i32
    %c0_i32_1 = arith.constant 0 : i32
    return %c0_i32, %c0_i32_0 : i32, i32
  }
  func.func @transform_19(%arg0: i32) -> (i32, i32, i32) {
    %c0_i32 = arith.constant 0 : i32
    %c0_i32_0 = arith.constant 0 : i32
    %c0_i32_1 = arith.constant 0 : i32
    return %arg0, %c0_i32, %c0_i32_0 : i32, i32, i32
  }
}

</mosaic_0001>

<bundles_post_ra>
// kernel: tpu_custom_call.1
= control target key start
LH: loop header
LB: loop body
LE: loop exit
PB: predicated region body
PF: predicated region fallthrough
CT: control target
= control target key end

     0   :  { %s3732_s0 = inlined_call_operand.vmem [shape: f32[2,16,8], index: 0, kind: input, shape index: {}]   ;;  %s3733_s1 = inlined_call_operand.vmem [shape: f32[2,16,1], index: 1, kind: input, shape index: {}]   ;;  %s3734_s2 = inlined_call_operand.vmem [shape: f32[2,16,128], index: 2, kind: input, shape index: {}]   ;;  %s3735_s3 = inlined_call_operand.hbm [shape: f32[2,1,16], index: 3, kind: input, shape index: {}]   ;;  %s3736_s4 = inlined_call_operand.hbm [shape: f32[2,1,8], index: 4, kind: input, shape index: {}]   ;;  %s3737_s5 = inlined_call_operand.hbm [shape: bf16[3,8,128], index: 5, kind: input, shape index: {}]   ;;  %s3738_s6 = inlined_call_operand.vmem [shape: f32[1,128], index: 6, kind: input, shape index: {}]   ;;  %s3739_s7 = inlined_call_operand.hbm [shape: bf16[3,128,128], index: 7, kind: input, shape index: {}]   ;;  %s3740_s8 = inlined_call_operand.hbm [shape: f32[1,128], index: 8, kind: input, shape index: {}]   ;;  %s3741_s9 = inlined_call_operand.vmem [shape: f32[3,1,32], index: 9, kind: input, shape index: {}]   ;;  %s3742_s10 = inlined_call_operand.vmem [shape: f32[1,32], index: 10, kind: input, shape index: {}]   ;;  %s3743_s11 = inlined_call_operand.hbm [shape: bf16[128,256], index: 11, kind: input, shape index: {}]   ;;  %s3744_s12 = inlined_call_operand.vmem [shape: bf16[32,256], index: 12, kind: input, shape index: {}]   ;;  %s3745_s13 = inlined_call_operand.hbm [shape: bf16[128,256], index: 13, kind: input, shape index: {}]   ;;  %s3746_s14 = inlined_call_operand.vmem [shape: bf16[16,256], index: 14, kind: input, shape index: {}]   ;;  %s3747_s15 = inlined_call_operand.vmem [shape: bf16[8,256], index: 15, kind: input, shape index: {}]   ;;  %s3748_s16 = inlined_call_operand.vmem [shape: f32[1,256], index: 16, kind: input, shape index: {}]   ;;  %s3749_s17 = inlined_call_operand.hbm [shape: bf16[256,256], index: 17, kind: input, shape index: {}]   ;;  %s3750_s18 = inlined_call_operand.vmem [shape: f32[1,256], index: 18, kind: input, shape index: {}]   ;;  %s3751_s19 = inlined_call_operand.hbm [shape: f32[2,16,256], index: 19, kind: output, shape index: {}]  }
   0x1   :  { %3762 = sst [smem:[#allocation27_spill]] %s3732_s0 }
   0x2   :  { %3763 = sst [smem:[#allocation28_spill]] %s3733_s1 }
   0x3   :  { %3764 = sst [smem:[#allocation29_spill]] %s3734_s2 }
   0x4   :  { %3765 = sst [smem:[#allocation30_spill]] %s3735_s3 }
   0x5   :  { %3766 = sst [smem:[#allocation31_spill]] %s3737_s5 }
   0x6   :  { %3767 = sst [smem:[#allocation32_spill]] %s3739_s7 }
   0x7   :  { %3768 = sst [smem:[#allocation33_spill]] %s3740_s8 }
   0x8   :  { %3769 = sst [smem:[#allocation34_spill]] %s3743_s11 }
   0x9   :  { %3770 = sst [smem:[#allocation35_spill]] %s3745_s13 }
   0xa   :  { %3771 = sst [smem:[#allocation36_spill]] %s3748_s16 }
   0xb   :  { %3772 = sst [smem:[#allocation37_spill]] %s3749_s17 }
   0xc   :  { %3773 = sst [smem:[#allocation38_spill]] %s3750_s18 }
   0xd   :  { %3774 = sst [smem:[#allocation39_spill]] %s3751_s19 }
   0xe   :  { %24 = vsyncpa [#allocation3], 0 }
   0xf   :  { %26 = vsyncpa [#allocation3 + $0x1], 0 }
  0x10   :  { %27 = vsyncpa [#allocation6], 0 }
  0x11   :  { %29 = vsyncpa [#allocation6 + $0x1], 0 }
  0x12   :  { %30 = vsyncpa [#allocation9], 0 }
  0x13   :  { %31 = vsyncpa [#allocation12], 0 }
  0x14   :  { %32 = vsyncpa [#allocation15], 0 }
  0x15   :  { %33 = vsyncpa [#allocation4], 0 }
  0x16   :  { %35 = vsyncpa [#allocation4 + $0x1], 0  ;;  %s3265_s0 = smov 0   ;;  %s3267_s30 = smov 0  }
  0x17   :  { %s3269_s20 = smov 0   ;;  %s3271_s21 = smov 0  }
  0x18 LB: > { %3775 = sst [smem:[#allocation24_spill]] %s3141_s20  ;;  %s3147_s1 = smov [#allocation7]   ;;  %s3145_s21 = sphi %s3271_s21, %s3813_s21   ;;  %s3141_s20 = sphi %s3269_s20, %s3815_s20   ;;  %s3137_s30 = sphi %s3267_s30, %s3817_s30   ;;  %s3133_s0 = sphi %s3265_s0, %s3816_s0  }
  0x19   : > { %s508_s22 = sshll.u32 %s3147_s1, 4  ;;  %s3286_s2 = sadd.s32 4294967295, %s3145_s21   ;;  %s509_s22 = int_to_ptr.vmem [resolvable:$true] %s508_s22 }
  0x1a   : > { %p2343_p0 = scmp.ge.s32.totalorder %s3145_s21, 1  ;;  %p3754_p1 = scmp.eq.s32.totalorder %s3286_s2, 0 }
  0x1b   : > { %p496_p2 = scmp.lt.s32.totalorder %s3145_s21, 3  ;;  %s3148_s24 = smov [#allocation8]  }
  0x1c   : > { %s524_s25 = sshll.u32 %s3148_s24, 4  ;;  %s3149_s26 = smov [#allocation11]   ;;  %s3304_s25 = int_to_ptr.vmem [resolvable:$true] %s524_s25 }
  0x1d   : > { %p3291_p3 = pnand %p2343_p0, %p496_p2  ;;  %s554_s27 = sshll.u32 %s3149_s26, 4  ;;  %s3306_s27 = int_to_ptr.vmem [resolvable:$true] %s554_s27 }
  0x1e   : > { %s2860_s29 = scalar_lea.vmem %s509_s22, 192  ;;  %p2868_p11 = scmp.lt.s32.totalorder %s509_s22, %s509_s22 }
  0x1f   : > { %s3776_s23 = scalar_select %p3291_p3, 1, 0 }
  0x20   : > { %p2626_p5 = pneg %p3291_p3  ;;  %p2861_p8 = scmp.ne.s32.totalorder %s509_s22, %s2860_s29 }
  0x21   : > { %p2869_p12 = scmp.lt.s32.totalorder %s2860_s29, %s2860_s29 }
  0x22   : > { %p3300_p6 = pnand %p2626_p5, %p3754_p1 }
  0x23   : > { %p2870_p13 = por %p2869_p12, %p2868_p11 }
  0x24   : > { %p3310_p7 = pneg %p3300_p6 }
  0x26   : > { %p2863_p9 = pnand %p2861_p8, %p3310_p7 }
  0x28   : > { %p2864_p10 = pneg %p2863_p9 }
  0x2a   : > { %p2871_p0 = pnand %p2870_p13, %p2864_p10 }
  0x2c   : > { %2874 = shalt.err (!%p2871_p0)
}
  0x2d   : > { %s3150_s1 = smov 64   ;;  %s3151_s24 = smov 4  }
  0x2e   : > { %s3779_s5 = sld [smem:[#allocation31_spill]]  ;;  %s2886_s18 = scalar_lea.vmem %s3304_s25, 3072 }
  0x2f   : > { %p2887_p2 = scmp.ne.s32.totalorder %s3304_s25, %s2886_s18  ;;  %p2894_p9 = scmp.lt.s32.totalorder %s3304_s25, %s3304_s25 }
  0x30   : > { %p2895_p10 = scmp.lt.s32.totalorder %s2886_s18, %s2886_s18 }
  0x31   : > { %p2889_p5 = pnand %p2887_p2, %p3310_p7 }
  0x32   : > { %p2896_p11 = por %p2895_p10, %p2894_p9 }
  0x33   : > { %p2890_p8 = pneg %p2889_p5 }
  0x34   : > { %2629 = dma.hbm_to_vmem [thread:$0]  (!%p3300_p6), %s3779_s5, 192, %s509_s22, [#allocation6], %s3150_s1, %s3150_s1, %s3151_s24  }
  0x35   : > { %p2897_p12 = pnand %p2896_p11, %p2890_p8 }
  0x37   : > { %2900 = shalt.err (!%p2897_p12)
}
  0x38   : > { %s3780_s7 = sld [smem:[#allocation32_spill]]  ;;  %s2912_s19 = scalar_lea.vmem %s3306_s27, 2048 }
  0x39   : > { %p2913_p13 = scmp.ne.s32.totalorder %s3306_s27, %s2912_s19  ;;  %p2920_p5 = scmp.lt.s32.totalorder %s3306_s27, %s3306_s27 }
  0x3a   : > { %p2921_p8 = scmp.lt.s32.totalorder %s2912_s19, %s2912_s19 }
  0x3b   : > { %p2915_p0 = pnand %p2913_p13, %p3310_p7 }
  0x3c   : > { %p2922_p9 = por %p2921_p8, %p2920_p5 }
  0x3d   : > { %p2916_p2 = pneg %p2915_p0 }
  0x3e   : > { %2632 = dma.hbm_to_vmem [thread:$0]  (!%p3300_p6), %s3780_s7, 3072, %s3304_s25, [#allocation9], %s3150_s1, %s3150_s1, %s3151_s24  }
  0x3f   : > { %p2923_p10 = pnand %p2922_p9, %p2916_p2 }
  0x41   : > { %2926 = shalt.err (!%p2923_p10)
}
  0x42   : > { %s3152_s18 = smov 128   ;;  %s3153_s16 = smov 8  }
  0x43   : > { %s3781_s11 = sld [smem:[#allocation34_spill]]  ;;  %s3154_s1 = smov [#allocation10]  }
  0x44   : > { %s538_s24 = sshll.u32 %s3154_s1, 4  ;;  %s3155_s26 = smov [#allocation13]   ;;  %s539_s24 = int_to_ptr.vmem [resolvable:$true] %s538_s24 }
  0x45   : > { %s570_s29 = sshll.u32 %s3155_s26, 4  ;;  %s2938_s19 = scalar_lea.vmem %s539_s24, 16  ;;  %s571_s29 = int_to_ptr.vmem [resolvable:$true] %s570_s29 }
  0x46   : > { %p2939_p11 = scmp.ne.s32.totalorder %s539_s24, %s2938_s19  ;;  %s2945_s5 = scalar_lea.vmem %s539_s24, 32 }
  0x47   : > { %p2946_p0 = scmp.lt.s32.totalorder %s539_s24, %s539_s24  ;;  %p2947_p2 = scmp.lt.s32.totalorder %s2945_s5, %s2938_s19 }
  0x48   : > { %p2941_p12 = pnand %p2939_p11, %p3310_p7 }
  0x49   : > { %2638 = dma.hbm_to_vmem [thread:$0]  (!%p3300_p6), %s3781_s11, 2048, %s3306_s27, [#allocation12], %s3152_s18, %s3152_s18, %s3153_s16  }
  0x4a   : > { %p2942_p13 = pneg %p2941_p12  ;;  %p2948_p5 = por %p2947_p2, %p2946_p0 }
  0x4c   : > { %p2949_p8 = pnand %p2948_p5, %p2942_p13 }
  0x4e   : > { %2952 = shalt.err (!%p2949_p8)
}
  0x4f   : > { %s3782_s8 = sld [smem:[#allocation33_spill]]  ;;  %s2964_s25 = scalar_lea.vmem %s571_s29, 2048 }
  0x50   : > { %p2965_p9 = scmp.ne.s32.totalorder %s571_s29, %s2964_s25  ;;  %p2972_p12 = scmp.lt.s32.totalorder %s571_s29, %s571_s29 }
  0x51   : > { %p2973_p4 = scmp.lt.s32.totalorder %s2964_s25, %s2964_s25 }
  0x52   : > { %p2967_p10 = pnand %p2965_p9, %p3310_p7 }
  0x53   : > { %p2974_p1 = por %p2973_p4, %p2972_p12 }
  0x54   : > { %p2968_p11 = pneg %p2967_p10 }
  0x55   : > { %2635 = dma.hbm_to_vmem [thread:$0]  (!%p3300_p6), %s3782_s8, 16, %s539_s24, [#allocation9]  }
  0x56   : > { %p2975_p3 = pnand %p2974_p1, %p2968_p11 }
  0x58   : > { %2978 = shalt.err (!%p2975_p3)
}
  0x59   : > { %s3783_s13 = sld [smem:[#allocation35_spill]]  ;;  %s3156_s24 = smov [#allocation14]  }
  0x5a   : > { %s592_s26 = sshll.u32 %s3156_s24, 4  ;;  %s593_s26 = int_to_ptr.vmem [resolvable:$true] %s592_s26 }
  0x5b   : > { %s2990_s19 = scalar_lea.vmem %s593_s26, 4096  ;;  %p2998_p1 = scmp.lt.s32.totalorder %s593_s26, %s593_s26 }
  0x5c   : > { %p2991_p13 = scmp.ne.s32.totalorder %s593_s26, %s2990_s19  ;;  %p2999_p3 = scmp.lt.s32.totalorder %s2990_s19, %s2990_s19 }
  0x5e   : > { %p2993_p0 = pnand %p2991_p13, %p3310_p7  ;;  %p3000_p2 = por %p2999_p3, %p2998_p1 }
  0x5f   : > { %2641 = dma.hbm_to_vmem [thread:$0]  (!%p3300_p6), %s3783_s13, 2048, %s571_s29, [#allocation12], %s3152_s18, %s3152_s18, %s3153_s16  }
  0x60   : > { %p2994_p4 = pneg %p2993_p0 }
  0x62   : > { %p3001_p5 = pnand %p3000_p2, %p2994_p4 }
  0x64   : > { %3004 = shalt.err (!%p3001_p5)
}
  0x65   : > { %s3784_s17 = sld [smem:[#allocation37_spill]]  ;;  %s2342_s3 = sadd.s32 4294967294, %s3145_s21  }
  0x66   : > { %s3377_s28 = sadd.s32 1, %s3145_s21   ;;  %s126_s25 = sadd.s32 1, %s3141_s20 }
  0x67   : > { %3785 = sst [smem:[#allocation25_spill]] %s3377_s28  ;;  %s123_s27 = ssub.s32 %s3145_s21, %s3377_s28 }
  0x68   : > { %p124_p7 = scmp.eq.s32.totalorder %s123_s27, 0  ;;  %p133_p8 = scmp.ne.s32.totalorder %s3141_s20, %s3137_s30 }
  0x69   : > { %p134_p9 = scmp.eq.s32.totalorder %s3145_s21, 0  ;;  %p139_p10 = scmp.ne.s32.totalorder %s3137_s30, %s3133_s0 }
  0x6a   : > { %s3388_s5 = scalar_select %p124_p7, %s3141_s20, %s126_s25  }
  0x6b   : > { %2644 = dma.hbm_to_vmem [thread:$0]  (!%p3300_p6), %s3784_s17, 4096, %s593_s26, [#allocation15], %s3152_s18, %s3152_s18, %s3153_s16  }
  0x6c   : > { %3786 = sst [smem:[#allocation26_spill]] %s3388_s5  ;;  %p3390_p11 = por %p134_p9, %p133_p8 }
  0x6d   : > { %p3788_p12 = scmp.eq.s32.totalorder %s3286_s2, 0  ;;  %p483_p13 = scmp.eq.s32.totalorder %s3286_s2, 1 }
  0x6e   : > { %p489_p0 = scmp.eq.s32.totalorder %s2342_s3, 1  ;;  %p2662_p4 = scmp.lt.s32.totalorder %s3145_s21, 2 }
  0x6f   : > { %p3396_p6 = por %p3788_p12, %p139_p10  ;;  %s3403_s16 = sand.u32 1, %s3141_s20  }
  0x70   : > { %p3405_p1 = por %p483_p13, %p133_p8  ;;  %p3409_p3 = por %p489_p0, %p139_p10 }
  0x71   : > { %s3789_s18 = scalar_select %p3396_p6, 1, 0 }
  0x72   : > { %s3790_s24 = scalar_select %p3405_p1, 1, 0 }
  0x73   : > { %s3791_s26 = scalar_select %p3409_p3, 1, 0 }
  0x74   : > { %s2351_s19 = sshll.u32 %s3145_s21, 4  ;;  %s636_s22 = scalar_lea.vmem [#allocation2], %s3403_s16 }
  0x75   : > { %s643_s29 = sshll.u32 %s636_s22, 4  ;;  %s3792_s7 = sld [smem:[#allocation30_spill]]  ;;  %s3420_s29 = int_to_ptr.vmem [resolvable:$true] %s643_s29 }
  0x76   : > { %p3424_p2 = pnand %p2662_p4, %p3390_p11  ;;  %s3431_s22 = scalar_lea.hbm %s3736_s4, %s2351_s19 }
  0x77   : > { %s650_s27 = sand.u32 1, %s3145_s21   ;;  %s634_s25 = scalar_lea.sflag [#allocation3], %s3403_s16 }
  0x78   : > { %p3007_p7 = pneg %p3424_p2 }
  0x7b   : > { %s3418_s3 = scalar_lea.hbm %s3792_s7, %s2351_s19  ;;  %s3010_s20 = scalar_lea.hbm %s3792_s7, 32 }
  0x7c   : > { %s3005_s17 = scalar_lea.hbm %s3418_s3, 16  ;;  %p3011_p10 = scmp.lt.s32.totalorder %s3418_s3, %s3792_s7 }
  0x7d   : > { %p3006_p5 = scmp.ne.s32.totalorder %s3418_s3, %s3005_s17  ;;  %p3012_p11 = scmp.lt.s32.totalorder %s3010_s20, %s3005_s17 }
  0x7f   : > { %p3008_p8 = pnand %p3007_p7, %p3006_p5  ;;  %p3013_p12 = por %p3012_p11, %p3011_p10 }
  0x81   : > { %p3009_p9 = pneg %p3008_p8 }
  0x83   : > { %p3014_p13 = pnand %p3013_p12, %p3009_p9 }
  0x85   : > { %3017 = shalt.err (!%p3014_p13)
}
  0x86   : > { %s3018_s13 = scalar_lea.vmem %s3420_s29, 16  ;;  %s3157_s5 = smov [#allocation2]  }
  0x87   : > { %p3019_p0 = scmp.ne.s32.totalorder %s3420_s29, %s3018_s13  ;;  %s3023_s19 = sshll.u32 %s3157_s5, 4  ;;  %s3024_s19 = int_to_ptr.vmem [resolvable:$false] %s3023_s19 }
  0x88   : > { %s3025_s1 = scalar_lea.vmem %s3024_s19, 32  ;;  %p3026_p8 = scmp.lt.s32.totalorder %s3420_s29, %s3024_s19 }
  0x89   : > { %p3021_p4 = pnand %p3019_p0, %p3007_p7  ;;  %p3027_p3 = scmp.lt.s32.totalorder %s3025_s1, %s3018_s13 }
  0x8b   : > { %p3022_p5 = pneg %p3021_p4  ;;  %p3028_p1 = por %p3027_p3, %p3026_p8 }
  0x8d   : > { %p3029_p10 = pnand %p3028_p1, %p3022_p5 }
  0x8f   : > { %3032 = shalt.err (!%p3029_p10)
}
  0x90   : > { %2648 = dma.hbm_to_vmem [thread:$0]  (!%p3424_p2), %s3418_s3, 16, %s3420_s29, %s634_s25  }
  0x91   : > { %s653_s17 = scalar_lea.vmem [#allocation5], %s3403_s16  ;;  %s651_s28 = scalar_lea.sflag [#allocation6], %s650_s27 }
  0x92   : > { %s660_s20 = sshll.u32 %s653_s17, 4  ;;  %s3033_s11 = scalar_lea.hbm %s3431_s22, 16  ;;  %s661_s20 = int_to_ptr.vmem [resolvable:$true] %s660_s20 }
  0x93   : > { %p3034_p3 = scmp.ne.s32.totalorder %s3431_s22, %s3033_s11  ;;  %s3038_s19 = scalar_lea.hbm %s3736_s4, 32 }
  0x94   : > { %p3039_p11 = scmp.lt.s32.totalorder %s3431_s22, %s3736_s4  ;;  %p3040_p12 = scmp.lt.s32.totalorder %s3038_s19, %s3033_s11 }
  0x95   : > { %p3036_p1 = pnand %p3034_p3, %p3007_p7 }
  0x96   : > { %p3041_p13 = por %p3040_p12, %p3039_p11 }
  0x97   : > { %p3037_p9 = pneg %p3036_p1 }
  0x99   : > { %p3042_p0 = pnand %p3041_p13, %p3037_p9 }
  0x9b   : > { %3045 = shalt.err (!%p3042_p0)
}
  0x9c   : > { %s3046_s16 = scalar_lea.vmem %s661_s20, 16  ;;  %s3158_s29 = smov [#allocation5]  }
  0x9d   : > { %p3047_p4 = scmp.ne.s32.totalorder %s661_s20, %s3046_s16  ;;  %s3051_s3 = sshll.u32 %s3158_s29, 4  ;;  %s3052_s3 = int_to_ptr.vmem [resolvable:$false] %s3051_s3 }
  0x9e   : > { %s3053_s27 = scalar_lea.vmem %s3052_s3, 32  ;;  %p3054_p10 = scmp.lt.s32.totalorder %s661_s20, %s3052_s3 }
  0x9f   : > { %p3049_p5 = pnand %p3047_p4, %p3007_p7  ;;  %p3055_p3 = scmp.lt.s32.totalorder %s3053_s27, %s3046_s16 }
  0xa1   : > { %p3050_p8 = pneg %p3049_p5  ;;  %p3056_p1 = por %p3055_p3, %p3054_p10 }
  0xa3   : > { %p3057_p6 = pnand %p3056_p1, %p3050_p8 }
  0xa5   : > { %3060 = shalt.err (!%p3057_p6)
}
  0xa6   : > { %2651 = dma.hbm_to_vmem [thread:$0]  (!%p3424_p2), %s3431_s22, 16, %s661_s20, %s651_s28  }
  0xa7   : > { %p3794_p9 = scmp.ne.s32.totalorder %s3776_s23, 0 }
  0xa8   : > { %s3483_s7 = sand.u32 (!%p3794_p9), 1, %s3137_s30   ;;  %p3795_p7 = scmp.ne.s32.totalorder (!%p3794_p9), %s3789_s18, 0 }
  0xa9   : > { %669 = sbr.rel (%p3794_p9) target bundleno = 1119 (0x45f), region = 96  ;;  %s672_s25 = scalar_lea.sflag (!%p3794_p9), [#allocation3], %s3483_s7 }
  0xaa   : > { %s674_s17 = scalar_lea.vmem (!%p3794_p9), [#allocation2], %s3483_s7 }
  0xae   : > { %3104 = dma.done.wait (%p3795_p7), %s672_s25, 16  }
  0xaf   : > { %3106 = vsyncadd (%p3795_p7), %s672_s25, 4294967280  ;;  %s679_s8 = sand.u32 1, %s3286_s2   ;;  %s682_s23 = scalar_lea.vmem [#allocation5], %s3483_s7 }
  0xb0   : > { %s680_s22 = scalar_lea.sflag [#allocation6], %s679_s8 }
  0xb1   : > { %3108 = dma.done.wait (%p3795_p7), %s680_s22, 16  }
  0xb2   : > { %3110 = vsyncadd (%p3795_p7), %s680_s22, 4294967280  ;;  %p3796_p6 = scmp.eq.s32.totalorder %s3286_s2, 0 }
  0xb4   : > { %3112 = dma.done.wait (%p3796_p6), [#allocation6], 192   ;;  %p3797_p2 = pmov %p3796_p6 }
  0xb6   : > { %3114 = vsyncadd (%p3797_p2), [#allocation6], 4294967104  ;;  %p3798_p11 = pmov %p3797_p2 }
  0xb7   : > { %p3799_p12 = pmov %p3797_p2 }
  0xb8   : > { %3116 = dma.done.wait (%p3798_p11), [#allocation9], 3088  }
  0xb9   : > { %3118 = vsyncadd (%p3799_p12), [#allocation9], 4294964208  ;;  %p3800_p13 = pmov %p3797_p2 }
  0xba   : > { %p3801_p0 = pmov %p3797_p2 }
  0xbb   : > { %3120 = dma.done.wait (%p3800_p13), [#allocation12], 4096  }
  0xbc   : > { %3122 = vsyncadd (%p3801_p0), [#allocation12], 4294963200  ;;  %p3802_p4 = pmov %p3801_p0 }
  0xbd   : > { %p3803_p5 = pmov %p3801_p0 }
  0xbe   : > { %3124 = dma.done.wait (%p3802_p4), [#allocation15], 4096  }
  0xbf   : > { %3126 = vsyncadd (%p3803_p5), [#allocation15], 4294963200  ;;  %p779_p8 = scmp.lt.s32.totalorder %s3286_s2, 1  ;;  %v3159_v0 = vmov 0.0   ;;  %vm3160_vm0 = vmmov 0   ;;  %vm806_vm1 = vcmask 1043456   ;;  %v939_v21 = vlaneseq }
  0xc0   : > { %2518 = vmatprep.subr.bf16.mxu0 %v3159_v0  ;;  %2520 = vmatprep.mubr.msk.bf16.mxu0 %vm3160_vm0, %v3159_v0  ;;  %s3804_s13 = sld [smem:[#allocation27_spill]]  ;;  %v797_v1 = vld [vmem:[#allocation7] sm:$0xf]  ;;  %v798_v6 = vld [vmem:[#allocation7 + $0x4] sm:$0xf]  ;;  %vm802_vm2 = vcmask 64512  }
  0xc1   : > { %2524 = vmatprep.subr.bf16.mxu1 %v3159_v0  ;;  %s780_s18 = scalar_select %p779_p8, %s3286_s2, 1  ;;  %2526 = vmatprep.mubr.msk.bf16.mxu1 %vm3160_vm0, %v3159_v0  ;;  %v808_v4 = vsel %vm806_vm1, %v797_v1, 0  ;;  %v799_v7 = vld [vmem:[#allocation7 + $0x8] sm:$0xf]  ;;  %v852_v8 = vsel %vm806_vm1, %v798_v6, 0  ;;  %v2719_v11 = vld [vmem:[#allocation8 + $0x30] sm:$0xff]  }
  0xc2   : > { %2519 = vmatpush3.bf16.msra.mxu0 %v808_v4  ;;  %2525 = vmatpush3.bf16.msra.mxu1 %v852_v8  ;;  %v896_v9 = vsel %vm806_vm1, %v799_v7, 0  ;;  %v2718_v10 = vld [vmem:[#allocation8 + $0x38] sm:$0xff]   ;;  %v2720_v12 = vld [vmem:[#allocation8 + $0x28] sm:$0xff]   ;;  %v2721_v13 = vld [vmem:[#allocation8 + $0x20] sm:$0xff]   ;;  %s3805_s16 = sld [smem:[#allocation28_spill]]  ;;  %v3161_v18 = vmov 0  }
  0xc3   : > { %s3521_s20 = sshll.u32 %s780_s18, 4  ;;  %2530 = vmatprep.subr.bf16.mxu0 %v3159_v0  ;;  %2536 = vmatprep.subr.bf16.mxu1 %v3159_v0  ;;  %v2722_v14 = vld [vmem:[#allocation8 + $0x18] sm:$0xff]   ;;  %v2723_v15 = vld [vmem:[#allocation8 + $0x10] sm:$0xff]   ;;  %v2724_v16 = vld [vmem:[#allocation8 + $0x8] sm:$0xff]   ;;  %v3553_v24 = vshrl.u32 %v939_v21, 7  ;;  %vm1455_vm7 = vcmask 130048  }
  0xc4   : > { %v2725_v17 = vld [vmem:[#allocation8] sm:$0xff]   ;;  %2717 = vset.pattern.permute.xlu0 %v3161_v18  ;;  %v2370_v45 = vld [vmem:[%s3738_s6] ss:$0 sm:$0xff]  ;;  %v2726_v55 = vld [vmem:[#allocation8 + $0x78] sm:$0xff]   ;;  %vm1556_vm8 = vcmask 261120   ;;  %s3806_s19 = sld [smem:[#allocation29_spill]] }
  0xc5   : > { %vm946_vm3 = vcmp.lt.s32.totalorder %v3553_v24, 1  ;;  %vm942_vm4 = vcmp.eq.s32.totalorder %v3553_v24, 0  ;;  %v3560_v35 = vadd.s32 8, %v3553_v24  ;;  %vm955_vm5 = vcmp.lt.s32.totalorder %v3553_v24, 7  ;;  %v2727_v57 = vld [vmem:[#allocation8 + $0x70] sm:$0xff]   ;;  %v2728_v58 = vld [vmem:[#allocation8 + $0x68] sm:$0xff]  }
  0xc6   : > { %s783_s5 = scalar_lea.vmem %s3804_s13, %s3521_s20  ;;  %v2729_v59 = vld [vmem:[#allocation8 + $0x60] sm:$0xff]   ;;  %v2730_v60 = vld [vmem:[#allocation8 + $0x58] sm:$0xff]   ;;  %v2731_v61 = vld [vmem:[#allocation8 + $0x50] sm:$0xff]   ;;  %s2360_s27 = sshll.u32 %s3483_s7, 5 }
  0xc7   : > { %v795_v2 = vld [vmem:[%s783_s5] sm:$0xff]  ;;  %v796_v3 = vld [vmem:[%s783_s5 + $0x8] sm:$0xff]  ;;  %vm952_vm6 = vcmp.eq.s32.totalorder %v3560_v35, 15  ;;  %v2732_v62 = vld [vmem:[#allocation8 + $0x48] sm:$0xff]   ;;  %s778_s25 = scalar_lea.vmem [#allocation16], %s2360_s27  ;;  %s2484_s22 = sshll.u32 %s3286_s2, 9 }
  0xc8   : > { %v801_v5 = vpack.c.bf16 %v796_v3, %v795_v2  ;;  %s788_s29 = scalar_lea.vmem %s3805_s16, %s3521_s20  ;;  %v2733_v63 = vld [vmem:[#allocation8 + $0x40] sm:$0xff]   ;;  %v2734_v1 = vld [vmem:[#allocation8 + $0xb8] sm:$0xff]   ;;  %v2735_v2 = vld [vmem:[#allocation8 + $0xb0] sm:$0xff]   ;;  %s2159_s8 = sshll.u32 %s778_s25, 4  ;;  %s3684_s8 = int_to_ptr.vmem [resolvable:$true] %s2159_s8 }
  0xc9   : > { %v1317_v19 = vld [vmem:[%s788_s29] sm:$0xff]  ;;  %v1318_v20 = vld [vmem:[%s788_s29 + $0x8] sm:$0xff]  ;;  %v2736_v3 = vld [vmem:[#allocation8 + $0xa8] sm:$0xff]   ;;  %s3807_s29 = sld [smem:[#allocation36_spill]]  ;;  %s2146_s5 = scalar_lea.sflag [#allocation4], %s3483_s7 }
  0xca   : > { %2521 = vmatmul.mubr.msk.bf16.vlgmr.msra.gmra.mxu0 %vm802_vm2, %v801_v5  ;;  %2527 = vmatmul.mubr.msk.bf16.vlgmr.msra.gmra.mxu1 %vm802_vm2, %v801_v5  ;;  %v2737_v4 = vld [vmem:[#allocation8 + $0xa0] sm:$0xff]   ;;  %v2739_v6 = vld [vmem:[#allocation8 + $0x90] sm:$0xff]   ;;  %v2740_v7 = vld [vmem:[#allocation8 + $0x88] sm:$0xff]   ;;  %s793_s1 = scalar_lea.vmem %s3806_s19, %s3521_s20  ;;  %s3809_s11 = sld [smem:[#allocation39_spill]] }
  0xcb   : > { %2531 = vmatpush3.bf16.msra.mxu0 %v896_v9  ;;  %2532 = vmatprep.mubr.msk.bf16.mxu0 %vm3160_vm0, %v3159_v0  ;;  %v2741_v8 = vld [vmem:[#allocation8 + $0x80] sm:$0xff]   ;;  %s3061_s19 = scalar_lea.vmem %s3684_s8, 512  ;;  %p3810_p3 = scmp.ne.s32.totalorder %s3790_s24, 0 }
  0xcc   : > { %2537 = vmatpush3.bf16.msra.mxu1 %v2718_v10  ;;  %2552 = vmatprep.mubr.msk.bf16.mxu1 %vm3160_vm0, %v3159_v0  ;;  %v1389_v10 = vld [vmem:[%s3747_s15] sm:$0xff]  ;;  %p3062_p10 = scmp.ne.s32.totalorder %s3684_s8, %s3061_s19  ;;  %s3162_s2 = smov [#allocation16]  }
  0xcd   : > { %2538 = vmatprep.subr.bf16.mxu1 %v3159_v0  ;;  %1324 = vperm.xlu0 %2717, %v1317_v19  }
  0xce   : > { %p3063_p1 = pnand %p3062_p10, %p3810_p3 }
  0xd0   : > { %2539 = vmatpush3.bf16.msra.mxu1 %v2719_v11  ;;  %v2396_v11 = vld [vmem:[%s3741_s9] ss:$0 sm:$0xff]  ;;  %s3689_s13 = scalar_lea.hbm %s3809_s11, %s2484_s22  ;;  %p3064_p9 = pneg %p3063_p1 }
  0xd1   : > { %2540 = vmatprep.subr.bf16.mxu1 %v3159_v0  ;;  %1329 = vperm.xlu0 %2717, %v1318_v20   ;;  %v2397_v20 = vld [vmem:[%s3741_s9 + $0x1] ss:$0 sm:$0xff] }
  0xd2   : > { %2533 = vmatmul.mubr.msk.bf16.vlgmr.msra.gmra.mxu0 %vm802_vm2, %v801_v5  ;;  %v2738_v5 = vld [vmem:[#allocation8 + $0x98] sm:$0xff]  }
  0xd3   : > { %1436 = vmatprep.mubr.bf16.mxu0 %v3161_v18 }
  0xd4   : > { %2541 = vmatpush3.bf16.msra.mxu1 %v2720_v12  ;;  %v2401_v12 = vcombine.high %v1389_v10, %v1389_v10 }
  0xd5   : > { %2542 = vmatprep.subr.bf16.mxu1 %v3159_v0 }
  0xd6   : > { %2402 = vmatprep.subr.msk.bf16.mxu0 %vm806_vm1, %v2401_v12  ;;  %v2780_v12 = vld [vmem:[#allocation11 + $0x30] ss:$8 sps:$4 sm:$0xff]  }
  0xd8   : > { %2543 = vmatpush3.bf16.msra.mxu1 %v2721_v13  ;;  %v2400_v13 = vcombine.low %v1389_v10, %v1389_v10  ;;  %v2782_v10 = vld [vmem:[#allocation11 + $0x34] ss:$8 sps:$4 sm:$0xff]  }
  0xd9   : > { %2544 = vmatprep.subr.bf16.mxu1 %v3159_v0 }
  0xda   : > { %v1399_v19 = vsel %vm806_vm1, %v2400_v13, 0  ;;  %v2783_v13 = vld [vmem:[#allocation13 + $0x20] ss:$8 sps:$4 sm:$0xff]  }
  0xdb   : > { %1419 = vmatpush1.bf16.msra.mxu0 %v1399_v19  ;;  %v2797_v19 = vld [vmem:[#allocation13 + $0x4] ss:$8 sps:$4 sm:$0xff]  }
  0xdc   : > { %2545 = vmatpush3.bf16.msra.mxu1 %v2722_v14  ;;  %v2398_v14 = vld [vmem:[%s3741_s9 + $0x2] ss:$0 sm:$0xff] }
  0xdd   : > { %2546 = vmatprep.subr.bf16.mxu1 %v3159_v0 }
  0xe0   : > { %2547 = vmatpush3.bf16.msra.mxu1 %v2723_v15  ;;  %v1387_v15 = vld [vmem:[%s682_s23] sm:$0x1] }
  0xe1   : > { %2548 = vmatprep.subr.bf16.mxu1 %v3159_v0  ;;  %v1388_v21 = vpack.c.bf16 %v1387_v15, %v1387_v15  ;;  %v2786_v15 = vld [vmem:[#allocation11 + $0x20] ss:$8 sps:$4 sm:$0xff]  }
  0xe3   : > { %2403 = vmatmul.mubr.msk.bf16.vlgmr.msra.gmra.mxu0 %vm802_vm2, %v1388_v21  ;;  %v2795_v21 = vld [vmem:[#allocation13] ss:$8 sps:$4 sm:$0xff]  }
  0xe4   : > { %2549 = vmatpush3.bf16.msra.mxu1 %v2724_v16  ;;  %1491 = vmatprep.mubr.bf16.mxu0 %v3161_v18 }
  0xe5   : > { %2550 = vmatprep.subr.bf16.mxu1 %v3159_v0 }
  0xe8   : > { %2551 = vmatpush3.bf16.msra.mxu1 %v2725_v17  ;;  %v2746_v17 = vld [vmem:[%s3746_s14 + $0x4] ss:$8 sps:$4 sm:$0xff]  }
  0xe9   : > { %2556 = vmatprep.subr.bf16.mxu1 %v3159_v0  ;;  %1473 = vmatprep.subr.bf16.mxu0 %v2746_v17  ;;  %v2794_v17 = vld [vmem:[#allocation11 + $0x14] ss:$8 sps:$4 sm:$0xff]  }
 0x148   : > { %v1325_v9 = vpop.permute.xlu0 %1324 }
 0x149   : > { %v1354_v16 = vmul.f32 %v2398_v14, %v1325_v9 }
 0x18a   : > { %v844_v22 = vpop.f32.mrf.mxu0  ;;  %v888_v23 = vpop.f32.mrf.mxu1 }
 0x18b   : > { %v944_v30 = vrot.slane %v844_v22, 7  ;;  %v1330_v22 = vpop.permute.xlu0 %1329 }
 0x18c   : > { %v2522_v25 = vpop.f32.mrf.mxu0  ;;  %v2528_v26 = vpop.f32.mrf.mxu1 }
 0x18d   : > { %v1362_v26 = vrot.slane %v1354_v16, 1  ;;  %v2789_v16 = vld [vmem:[#allocation13 + $0x10] ss:$8 sps:$4 sm:$0xff]  }
 0x18e   : > { %v847_v27 = vpop.f32.mrf.mxu0  ;;  %v891_v29 = vpop.f32.mrf.mxu1 }
 0x18f   : > { %v945_v28 = vrot.slane %v847_v27, 7  ;;  %v1339_v27 = vmul.f32 %v2396_v11, %v1330_v22 }
 0x190   : > { %v2523_v31 = vpop.f32.mrf.mxu0  ;;  %v2529_v32 = vpop.f32.mrf.mxu1 }
 0x191   : > { %v948_v33 = vsel %vm946_vm3, %v945_v28, %v944_v30  ;;  %v947_v38 = vsel %vm946_vm3, %v944_v30, %v945_v28  ;;  %v1355_v28 = vmul.f32 %v2398_v14, %v1330_v22  ;;  %v1347_v30 = vmul.f32 %v2397_v20, %v1330_v22  ;;  %v2788_v14 = vld [vmem:[#allocation11 + $0x24] ss:$8 sps:$4 sm:$0xff]  }
 0x192   : > { %v932_v34 = vpop.f32.mrf.mxu0  ;;  %v949_v37 = vsel %vm942_vm4, 0.0, %v948_v33  ;;  %v961_v44 = vadd.f32 %v947_v38, %v891_v29  ;;  %v2749_v29 = vld [vmem:[%s3744_s12 + $0x14] ss:$8 sps:$4 sm:$0xff]   ;;  %v1346_v31 = vmul.f32 %v2397_v20, %v1325_v9  ;;  %v1357_v32 = vrot.slane %v1339_v27, 7  ;;  %v2792_v20 = vld [vmem:[#allocation11 + $0x10] ss:$8 sps:$4 sm:$0xff]  }
 0x193   : > { %v953_v40 = vrot.slane %v932_v34, 1  ;;  %v960_v42 = vadd.f32 %v949_v37, %v888_v23  ;;  %v2744_v23 = vld [vmem:[%s3746_s14] ss:$8 sps:$4 sm:$0xff]   ;;  %v1363_v33 = vrot.slane %v1355_v28, 1  ;;  %v2798_v27 = vld [vmem:[#allocation11] ss:$8 sps:$4 sm:$0xff]  }
 0x194   : > { %v2534_v36 = vpop.f32.mrf.mxu0  ;;  %1474 = vmatpush1.bf16.msra.mxu0 %v2744_v23  ;;  %v1383_v34 = vld [vmem:[%s674_s17] sm:$0x1]  ;;  %v1727_v23 = vld [vmem:[%s793_s1 + $0x8] sm:$0xff]  ;;  %s3808_s17 = sld [smem:[#allocation38_spill]] }
 0x195   : > { %v1365_v38 = vsel %vm955_vm5, %v1363_v33, %v1362_v26  ;;  %1572 = vmatprep.subr.bf16.mxu0 %v2749_v29  ;;  %v1726_v22 = vld [vmem:[%s793_s1] sm:$0xff]  ;;  %s3065_s1 = sshll.u32 %s3162_s2, 4  ;;  %s3066_s1 = int_to_ptr.vmem [resolvable:$false] %s3065_s1 }
 0x196   : > { %v935_v39 = vpop.f32.mrf.mxu0  ;;  %v2803_v28 = vld [vmem:[#allocation14 + $0x74] ss:$8 sps:$4 sm:$0xff]   ;;  %s3067_s20 = scalar_lea.vmem %s3066_s1, 1024  ;;  %p3068_p7 = scmp.lt.s32.totalorder %s3684_s8, %s3066_s1 }
 0x197   : > { %v954_v41 = vrot.slane %v935_v39, 1  ;;  %p3069_p6 = scmp.lt.s32.totalorder %s3067_s20, %s3061_s19 }
 0x198   : > { %v2535_v43 = vpop.f32.mrf.mxu0 }
 0x199   : > { %v956_v46 = vsel %vm955_vm5, %v953_v40, %v954_v41  ;;  %v957_v47 = vsel %vm955_vm5, %v954_v41, %v953_v40  ;;  %v1364_v41 = vsel %vm955_vm5, %v1362_v26, %v1363_v33  ;;  %v1728_v26 = vpack.c.bf16 %v1727_v23, %v1726_v22  ;;  %v2827_v22 = vld [vmem:[#allocation14 + $0xf4] ss:$8 sps:$4 sm:$0xff]   ;;  %v2825_v23 = vld [vmem:[#allocation14 + $0xf0] ss:$8 sps:$4 sm:$0xff]   ;;  %p3070_p2 = por %p3069_p6, %p3068_p7 }
 0x19a   : > { %v959_v48 = vsel %vm952_vm6, 0.0, %v957_v47  ;;  %v962_v49 = vadd.f32 %v960_v42, %v956_v46  ;;  %v1367_v42 = vsel %vm952_vm6, 0.0, %v1365_v38 }
 0x19b   : > { %v963_v50 = vadd.f32 %v961_v44, %v959_v48  ;;  %v1384_v44 = vpack.c.bf16 %v1383_v34, %v1383_v34  ;;  %v2399_v48 = vld [vmem:[%s3742_s10] ss:$0 sm:$0xff]  ;;  %p3071_p11 = pnand %p3070_p2, %p3064_p9 }
 0x19c   : > { %v970_v51 = vadd.f32 %v2370_v45, %v962_v49 }
 0x19d   : > { %v971_v52 = vadd.f32 %v2370_v45, %v963_v50  ;;  %v2747_v45 = vld [vmem:[%s3744_s12 + $0x10] ss:$8 sps:$4 sm:$0xff]   ;;  %2406 = vmatmul.mubr.msk.bf16.vlgmr.msra.gmra.mxu0 %vm1455_vm7, %v1384_v44 }
 0x19e   : > { %v972_v53 = vmax.f32 %v970_v51, 0.0  ;;  %1573 = vmatpush1.bf16.msra.mxu0 %v2747_v45  ;;  %1592 = vmatprep.mubr.bf16.mxu0 %v3161_v18 }
 0x19f   : > { %v973_v54 = vmax.f32 %v971_v52, 0.0 }
 0x1a1   : > { %v1023_v56 = vpack.c.bf16 %v973_v54, %v972_v53  ;;  %v2752_v53 = vld [vmem:[%s3744_s12 + $0x4] ss:$8 sps:$4 sm:$0xff]   ;;  %v2750_v54 = vld [vmem:[%s3744_s12] ss:$8 sps:$4 sm:$0xff]  }
 0x1a2   : > { %1574 = vmatprep.subr.bf16.mxu0 %v2752_v53 }
 0x1a3   : > { %2553 = vmatmul.mubr.bf16.vlgmr.msra.gmra.mxu1 %v1023_v56  ;;  %1575 = vmatpush1.bf16.msra.mxu0 %v2750_v54 }
 0x1a4   : > { %2557 = vmatpush3.bf16.msra.mxu1 %v2726_v55  ;;  %2572 = vmatprep.mubr.msk.bf16.mxu1 %vm3160_vm0, %v3159_v0 }
 0x1a5   : > { %2558 = vmatprep.subr.bf16.mxu1 %v3159_v0 }
 0x1a8   : > { %2559 = vmatpush3.bf16.msra.mxu1 %v2727_v57  ;;  %v2755_v57 = vld [vmem:[#allocation13 + $0x74] ss:$8 sps:$4 sm:$0xff]  }
 0x1a9   : > { %2560 = vmatprep.subr.bf16.mxu1 %v3159_v0 }
 0x1ac   : > { %2561 = vmatpush3.bf16.msra.mxu1 %v2728_v58  ;;  %v2756_v58 = vld [vmem:[#allocation11 + $0x70] ss:$8 sps:$4 sm:$0xff]  }
 0x1ad   : > { %2562 = vmatprep.subr.bf16.mxu1 %v3159_v0 }
 0x1b0   : > { %2563 = vmatpush3.bf16.msra.mxu1 %v2729_v59  ;;  %v2758_v59 = vld [vmem:[#allocation11 + $0x74] ss:$8 sps:$4 sm:$0xff]  }
 0x1b1   : > { %2564 = vmatprep.subr.bf16.mxu1 %v3159_v0  ;;  %1683 = vmatprep.subr.bf16.mxu0 %v2758_v59 }
 0x1b4   : > { %2565 = vmatpush3.bf16.msra.mxu1 %v2730_v60  ;;  %v2761_v60 = vld [vmem:[#allocation13 + $0x64] ss:$8 sps:$4 sm:$0xff]  }
 0x1b5   : > { %2566 = vmatprep.subr.bf16.mxu1 %v3159_v0 }
 0x1b8   : > { %2567 = vmatpush3.bf16.msra.mxu1 %v2731_v61  ;;  %v2764_v61 = vld [vmem:[#allocation11 + $0x64] ss:$8 sps:$4 sm:$0xff]  }
 0x1b9   : > { %2568 = vmatprep.subr.bf16.mxu1 %v3159_v0 }
 0x1bc   : > { %2569 = vmatpush3.bf16.msra.mxu1 %v2732_v62  ;;  %v2759_v62 = vld [vmem:[#allocation13 + $0x60] ss:$8 sps:$4 sm:$0xff]  }
 0x1bd   : > { %2570 = vmatprep.subr.bf16.mxu1 %v3159_v0 }
 0x1c0   : > { %2571 = vmatpush3.bf16.msra.mxu1 %v2733_v63  ;;  %v2762_v63 = vld [vmem:[#allocation11 + $0x60] ss:$8 sps:$4 sm:$0xff]  }
 0x1c1   : > { %2576 = vmatprep.subr.bf16.mxu1 %v3159_v0 }
 0x1c3   : > { %2573 = vmatmul.mubr.bf16.vlgmr.msra.gmra.mxu1 %v1023_v56 }
 0x1c4   : > { %2577 = vmatpush3.bf16.msra.mxu1 %v2734_v1  ;;  %2592 = vmatprep.mubr.msk.bf16.mxu1 %vm3160_vm0, %v3159_v0  ;;  %v2767_v1 = vld [vmem:[#allocation13 + $0x54] ss:$8 sps:$4 sm:$0xff]  }
 0x1c5   : > { %2578 = vmatprep.subr.bf16.mxu1 %v3159_v0 }
 0x1c8   : > { %2579 = vmatpush3.bf16.msra.mxu1 %v2735_v2  ;;  %v2770_v2 = vld [vmem:[#allocation11 + $0x54] ss:$8 sps:$4 sm:$0xff]  }
 0x1c9   : > { %2580 = vmatprep.subr.bf16.mxu1 %v3159_v0 }
 0x1cc   : > { %2581 = vmatpush3.bf16.msra.mxu1 %v2736_v3  ;;  %v2765_v3 = vld [vmem:[#allocation13 + $0x50] ss:$8 sps:$4 sm:$0xff]  }
 0x1cd   : > { %2582 = vmatprep.subr.bf16.mxu1 %v3159_v0 }
 0x1d0   : > { %2583 = vmatpush3.bf16.msra.mxu1 %v2737_v4  ;;  %v2773_v4 = vld [vmem:[#allocation13 + $0x44] ss:$8 sps:$4 sm:$0xff]  }
 0x1d1   : > { %2584 = vmatprep.subr.bf16.mxu1 %v3159_v0 }
 0x1d4   : > { %2585 = vmatpush3.bf16.msra.mxu1 %v2738_v5  ;;  %v2776_v5 = vld [vmem:[#allocation11 + $0x44] ss:$8 sps:$4 sm:$0xff]  }
 0x1d5   : > { %2586 = vmatprep.subr.bf16.mxu1 %v3159_v0 }
 0x1d8   : > { %2587 = vmatpush3.bf16.msra.mxu1 %v2739_v6  ;;  %v2771_v6 = vld [vmem:[#allocation13 + $0x40] ss:$8 sps:$4 sm:$0xff]  }
 0x1d9   : > { %2588 = vmatprep.subr.bf16.mxu1 %v3159_v0 }
 0x1dc   : > { %2589 = vmatpush3.bf16.msra.mxu1 %v2740_v7  ;;  %v2774_v7 = vld [vmem:[#allocation11 + $0x40] ss:$8 sps:$4 sm:$0xff]  }
 0x1dd   : > { %2590 = vmatprep.subr.bf16.mxu1 %v3159_v0  ;;  %v1338_v0 = vmul.f32 %v2396_v11, %v1325_v9  ;;  %v2777_v9 = vld [vmem:[#allocation13 + $0x30] ss:$8 sps:$4 sm:$0xff]   ;;  %v2785_v11 = vld [vmem:[#allocation13 + $0x24] ss:$8 sps:$4 sm:$0xff]  }
 0x1df   : > { %v1356_v25 = vrot.slane %v1338_v0, 7  ;;  %v2791_v0 = vld [vmem:[#allocation13 + $0x14] ss:$8 sps:$4 sm:$0xff]  }
 0x1e0   : > { %2591 = vmatpush3.bf16.msra.mxu1 %v2741_v8  ;;  %v2779_v8 = vld [vmem:[#allocation13 + $0x34] ss:$8 sps:$4 sm:$0xff]  }
 0x1e1   : > { %v1358_v36 = vsel %vm946_vm3, %v1356_v25, %v1357_v32  ;;  %v1359_v37 = vsel %vm946_vm3, %v1357_v32, %v1356_v25  ;;  %1825 = vmatprep.subr.bf16.mxu1 %v2755_v57  ;;  %v2800_v25 = vld [vmem:[#allocation11 + $0x4] ss:$8 sps:$4 sm:$0xff]  }
 0x1e2   : > { %v1360_v39 = vsel %vm942_vm4, 0.0, %v1359_v37  ;;  %v1369_v40 = vadd.f32 %v1358_v36, %v1347_v30 }
 0x1e3   : > { %2593 = vmatmul.mubr.bf16.vlgmr.msra.gmra.mxu1 %v1023_v56  ;;  %v1368_v43 = vadd.f32 %v1360_v39, %v1346_v31  ;;  %v2753_v56 = vld [vmem:[#allocation13 + $0x70] ss:$8 sps:$4 sm:$0xff]  }
 0x1e4   : > { %1857 = vmatprep.mubr.bf16.mxu1 %v3161_v18  ;;  %v1371_v47 = vadd.f32 %v1369_v40, %v1367_v42  ;;  %1826 = vmatpush1.bf16.msra.mxu1 %v2753_v56 }
 0x1e5   : > { %v1370_v46 = vadd.f32 %v1368_v43, %v1364_v41  ;;  %1827 = vmatprep.subr.bf16.mxu1 %v2761_v60 }
 0x1e6   : > { %v1380_v50 = vadd.f32 %v2399_v48, %v1371_v47 }
 0x1e7   : > { %v1379_v49 = vadd.f32 %v2399_v48, %v1370_v46 }
 0x1e8   : > { %v1382_v52 = vmax.f32 %v1380_v50, 0.0  ;;  %1828 = vmatpush1.bf16.msra.mxu1 %v2759_v62  ;;  %v2801_v62 = vld [vmem:[#allocation14 + $0x70] ss:$8 sps:$4 sm:$0xff]  }
 0x1e9   : > { %v1381_v51 = vmax.f32 %v1379_v49, 0.0  ;;  %1829 = vmatprep.subr.bf16.mxu1 %v2767_v1 }
 0x1eb   : > { %v1531_v55 = vpack.c.bf16 %v1382_v52, %v1381_v51  ;;  %v2395_v51 = vld [vmem:[#allocation10] ss:$0 sm:$0xff] }
 0x1ec   : > { %1830 = vmatpush1.bf16.msra.mxu1 %v2765_v3 }
 0x1ed   : > { %2411 = vmatmul.mubr.msk.bf16.vlgmr.msra.gmra.mxu0 %vm1556_vm8, %v1531_v55  ;;  %1831 = vmatprep.subr.bf16.mxu1 %v2773_v4 }
 0x1ee   : > { %1715 = vmatprep.mubr.bf16.mxu0 %v3161_v18  ;;  %1684 = vmatpush1.bf16.msra.mxu0 %v2756_v58  ;;  %v2768_v18 = vld [vmem:[#allocation11 + $0x50] ss:$8 sps:$4 sm:$0xff]  }
 0x1ef   : > { %1685 = vmatprep.subr.bf16.mxu0 %v2764_v61  ;;  %v1438_v61 = vpop.f32.mrf.mxu0 }
 0x1f0   : > { %1832 = vmatpush1.bf16.msra.mxu1 %v2771_v6 }
 0x1f1   : > { %1833 = vmatprep.subr.bf16.mxu1 %v2779_v8  ;;  %v1440_v1 = vpop.f32.mrf.mxu0 }
 0x1f2   : > { %1686 = vmatpush1.bf16.msra.mxu0 %v2762_v63 }
 0x1f3   : > { %1687 = vmatprep.subr.bf16.mxu0 %v2770_v2  ;;  %v2806_v2 = vld [vmem:[#allocation14 + $0x64] ss:$8 sps:$4 sm:$0xff]   ;;  %v1442_v3 = vpop.f32.mrf.mxu0 }
 0x1f4   : > { %1834 = vmatpush1.bf16.msra.mxu1 %v2777_v9  ;;  %v2812_v9 = vld [vmem:[#allocation14 + $0x44] ss:$8 sps:$4 sm:$0xff]  }
 0x1f5   : > { %1835 = vmatprep.subr.bf16.mxu1 %v2785_v11  ;;  %v1443_v4 = vpop.f32.mrf.mxu0 }
 0x1f6   : > { %1688 = vmatpush1.bf16.msra.mxu0 %v2768_v18  ;;  %v2804_v18 = vld [vmem:[#allocation14 + $0x60] ss:$8 sps:$4 sm:$0xff]  }
 0x1f7   : > { %1689 = vmatprep.subr.bf16.mxu0 %v2776_v5  ;;  %v2809_v5 = vld [vmem:[#allocation14 + $0x54] ss:$8 sps:$4 sm:$0xff]  }
 0x1f8   : > { %1836 = vmatpush1.bf16.msra.mxu1 %v2783_v13 }
 0x1f9   : > { %1837 = vmatprep.subr.bf16.mxu1 %v2791_v0  ;;  %v2813_v0 = vld [vmem:[#allocation14 + $0x30] ss:$8 sps:$4 sm:$0xff]  }
 0x1fa   : > { %1690 = vmatpush1.bf16.msra.mxu0 %v2774_v7  ;;  %v2807_v7 = vld [vmem:[#allocation14 + $0x50] ss:$8 sps:$4 sm:$0xff]  }
 0x1fb   : > { %1691 = vmatprep.subr.bf16.mxu0 %v2782_v10 }
 0x1fc   : > { %1838 = vmatpush1.bf16.msra.mxu1 %v2789_v16  ;;  %v2816_v16 = vld [vmem:[#allocation14 + $0x20] ss:$8 sps:$4 sm:$0xff]  }
 0x1fd   : > { %1839 = vmatprep.subr.bf16.mxu1 %v2797_v19  ;;  %v2819_v19 = vld [vmem:[#allocation14 + $0x10] ss:$8 sps:$4 sm:$0xff]  }
 0x1fe   : > { %1692 = vmatpush1.bf16.msra.mxu0 %v2780_v12  ;;  %v2810_v12 = vld [vmem:[#allocation14 + $0x40] ss:$8 sps:$4 sm:$0xff]  }
 0x1ff   : > { %1693 = vmatprep.subr.bf16.mxu0 %v2788_v14  ;;  %v2815_v14 = vld [vmem:[#allocation14 + $0x34] ss:$8 sps:$4 sm:$0xff]  }
 0x200   : > { %1840 = vmatpush1.bf16.msra.mxu1 %v2795_v21  ;;  %v2822_v21 = vld [vmem:[#allocation14] ss:$8 sps:$4 sm:$0xff]  }
 0x202   : > { %1694 = vmatpush1.bf16.msra.mxu0 %v2786_v15  ;;  %v2818_v15 = vld [vmem:[#allocation14 + $0x24] ss:$8 sps:$4 sm:$0xff]  }
 0x203   : > { %1695 = vmatprep.subr.bf16.mxu0 %v2794_v17  ;;  %1858 = vmatmul.mubr.bf16.vlgmr.msra.gmra.mxu1 %v1728_v26  ;;  %v2821_v17 = vld [vmem:[#allocation14 + $0x14] ss:$8 sps:$4 sm:$0xff]   ;;  %v2828_v26 = vld [vmem:[#allocation14 + $0xe0] ss:$8 sps:$4 sm:$0xff]  }
 0x206   : > { %1696 = vmatpush1.bf16.msra.mxu0 %v2792_v20  ;;  %v2824_v20 = vld [vmem:[#allocation14 + $0x4] ss:$8 sps:$4 sm:$0xff]  }
 0x207   : > { %1697 = vmatprep.subr.bf16.mxu0 %v2800_v25  ;;  %v2830_v25 = vld [vmem:[#allocation14 + $0xe4] ss:$8 sps:$4 sm:$0xff]  }
 0x20a   : > { %1698 = vmatpush1.bf16.msra.mxu0 %v2798_v27  ;;  %v2833_v27 = vld [vmem:[#allocation14 + $0xd4] ss:$8 sps:$4 sm:$0xff]  }
 0x20b   : > { %2094 = vmatprep.subr.bf16.mxu0 %v2803_v28  ;;  %v2831_v28 = vld [vmem:[#allocation14 + $0xd0] ss:$8 sps:$4 sm:$0xff]  }
 0x25d   : > { %v1493_v35 = vpop.f32.mrf.mxu0 }
 0x25e   : > { %v3668_v6 = vadd.f32 %v1493_v35, %v1438_v61 }
 0x25f   : > { %v1495_v8 = vpop.f32.mrf.mxu0 }
 0x260   : > { %v3670_v10 = vadd.f32 %v1495_v8, %v1440_v1 }
 0x261   : > { %v1497_v11 = vpop.f32.mrf.mxu0 }
 0x263   : > { %v1106_v29 = vpop.f32.mrf.mxu1  ;;  %v1498_v13 = vpop.f32.mrf.mxu0 }
 0x264   : > { %v1291_v39 = vrot.slane %v1106_v29, 7  ;;  %v2836_v29 = vld [vmem:[#allocation14 + $0xc4] ss:$8 sps:$4 sm:$0xff]  }
 0x265   : > { %v2554_v30 = vpop.f32.mrf.mxu1  ;;  %v1922_v13 = vld [vmem:[%s3808_s17] sm:$0x3] }
 0x266   : > { %v2834_v30 = vld [vmem:[#allocation14 + $0xc0] ss:$8 sps:$4 sm:$0xff]  }
 0x267   : > { %v1109_v31 = vpop.f32.mrf.mxu1 }
 0x268   : > { %v1292_v38 = vrot.slane %v1109_v31, 7  ;;  %v2839_v31 = vld [vmem:[#allocation14 + $0xb4] ss:$8 sps:$4 sm:$0xff]  }
 0x269   : > { %v2555_v32 = vpop.f32.mrf.mxu1 }
 0x26a   : > { %v1294_v41 = vsel %vm946_vm3, %v1292_v38, %v1291_v39  ;;  %v1293_v48 = vsel %vm946_vm3, %v1291_v39, %v1292_v38  ;;  %v2837_v32 = vld [vmem:[#allocation14 + $0xb0] ss:$8 sps:$4 sm:$0xff]   ;;  %v2848_v38 = vld [vmem:[#allocation14 + $0x84] ss:$8 sps:$4 sm:$0xff]   ;;  %v2846_v39 = vld [vmem:[#allocation14 + $0x80] ss:$8 sps:$4 sm:$0xff]  }
 0x26b   : > { %v1295_v44 = vsel %vm942_vm4, 0.0, %v1294_v41 }
 0x283   : > { %v1195_v33 = vpop.f32.mrf.mxu1 }
 0x284   : > { %v1303_v47 = vadd.f32 %v1295_v44, %v1195_v33  ;;  %v2842_v33 = vld [vmem:[#allocation14 + $0xa4] ss:$8 sps:$4 sm:$0xff]   ;;  %v1508_v44 = vsub.s32 1, %v3553_v24 }
 0x285   : > { %v2574_v34 = vpop.f32.mrf.mxu1 }
 0x286   : > { %v2840_v34 = vld [vmem:[#allocation14 + $0xa0] ss:$8 sps:$4 sm:$0xff]  }
 0x287   : > { %v1198_v36 = vpop.f32.mrf.mxu1 }
 0x288   : > { %v1304_v50 = vadd.f32 %v1293_v48, %v1198_v36  ;;  %v2845_v36 = vld [vmem:[#allocation14 + $0x94] ss:$8 sps:$4 sm:$0xff]  }
 0x289   : > { %v2575_v37 = vpop.f32.mrf.mxu1 }
 0x28a   : > { %v2843_v37 = vld [vmem:[#allocation14 + $0x90] ss:$8 sps:$4 sm:$0xff]  }
 0x2a3   : > { %v1284_v40 = vpop.f32.mrf.mxu1 }
 0x2a4   : > { %v1297_v45 = vrot.slane %v1284_v40, 1 }
 0x2a5   : > { %v2594_v42 = vpop.f32.mrf.mxu1 }
 0x2a7   : > { %v1287_v43 = vpop.f32.mrf.mxu1 }
 0x2a8   : > { %v1298_v46 = vrot.slane %v1287_v43, 1  ;;  %v1504_v43 = vsub.s32 0, %v3553_v24 }
 0x2a9   : > { %v2595_v49 = vpop.f32.mrf.mxu1 }
 0x2aa   : > { %v1299_v52 = vsel %vm955_vm5, %v1297_v45, %v1298_v46  ;;  %v1300_v53 = vsel %vm955_vm5, %v1298_v46, %v1297_v45  ;;  %v1500_v45 = vld [vmem:[%s3807_s29] sm:$0x3] }
 0x2ab   : > { %v1302_v54 = vsel %vm952_vm6, 0.0, %v1300_v53  ;;  %v1305_v55 = vadd.f32 %v1303_v47, %v1299_v52  ;;  %v1505_v48 = vrot.slane %v1500_v45, %v1504_v43  ;;  %v1509_v49 = vrot.slane %v1500_v45, %v1508_v44 }
 0x2ac   : > { %v1306_v56 = vadd.f32 %v1304_v50, %v1302_v54 }
 0x2ad   : > { %v1313_v57 = vadd.f32 %v2395_v51, %v1305_v55  ;;  %v1594_v40 = vpop.f32.mrf.mxu0  ;;  %v1512_v54 = vadd.f32 %v1505_v48, %v3668_v6  ;;  %v1513_v55 = vadd.f32 %v1509_v49, %v3670_v10 }
 0x2ae   : > { %v1314_v58 = vadd.f32 %v2395_v51, %v1306_v56 }
 0x2af   : > { %v1315_v59 = vmax.f32 %v1313_v57, 0.0  ;;  %v1596_v41 = vpop.f32.mrf.mxu0 }
 0x2b0   : > { %v1316_v60 = vmax.f32 %v1314_v58, 0.0 }
 0x2b1   : > { %v1598_v42 = vpop.f32.mrf.mxu0 }
 0x2b2   : > { %v1514_v63 = vpack.c.bf16 %v1316_v60, %v1315_v59 }
 0x2b3   : > { %v1600_v47 = vpop.f32.mrf.mxu0 }
 0x2b4   : > { %1716 = vmatmul.mubr.bf16.vlgmr.msra.gmra.mxu0 %v1514_v63  ;;  %v1879_v63 = vrot.slane %v1513_v55, %v1504_v43 }
 0x2b5   : > { %2095 = vmatpush1.bf16.msra.mxu0 %v2801_v62  ;;  %v1875_v62 = vrot.slane %v1512_v54, %v1504_v43 }
 0x2b6   : > { %2096 = vmatprep.subr.bf16.mxu0 %v2806_v2 }
 0x2b9   : > { %2097 = vmatpush1.bf16.msra.mxu0 %v2804_v18 }
 0x2ba   : > { %2098 = vmatprep.subr.bf16.mxu0 %v2809_v5 }
 0x2bd   : > { %2099 = vmatpush1.bf16.msra.mxu0 %v2807_v7 }
 0x2be   : > { %2100 = vmatprep.subr.bf16.mxu0 %v2812_v9 }
 0x2c1   : > { %2101 = vmatpush1.bf16.msra.mxu0 %v2810_v12 }
 0x2c2   : > { %2102 = vmatprep.subr.bf16.mxu0 %v2815_v14  ;;  %v1927_v14 = vrot.slane %v1922_v13, %v1504_v43 }
 0x2c3   : > { %v1859_v46 = vpop.f32.mrf.mxu1 }
 0x2c5   : > { %2103 = vmatpush1.bf16.msra.mxu0 %v2813_v0  ;;  %v1861_v50 = vpop.f32.mrf.mxu1  ;;  %v1931_v0 = vrot.slane %v1922_v13, %v1508_v44 }
 0x2c6   : > { %2104 = vmatprep.subr.bf16.mxu0 %v2818_v15 }
 0x2c7   : > { %v1863_v57 = vpop.f32.mrf.mxu1 }
 0x2c9   : > { %2105 = vmatpush1.bf16.msra.mxu0 %v2816_v16  ;;  %v1865_v3 = vpop.f32.mrf.mxu1 }
 0x2ca   : > { %2106 = vmatprep.subr.bf16.mxu0 %v2821_v17 }
 0x2cd   : > { %2107 = vmatpush1.bf16.msra.mxu0 %v2819_v19 }
 0x2ce   : > { %2108 = vmatprep.subr.bf16.mxu0 %v2824_v20 }
 0x2d1   : > { %2109 = vmatpush1.bf16.msra.mxu0 %v2822_v21 }
 0x2d2   : > { %2110 = vmatprep.subr.bf16.mxu0 %v2827_v22 }
 0x2d5   : > { %2111 = vmatpush2.bf16.msra.mxu0 %v2825_v23 }
 0x2d6   : > { %2112 = vmatprep.subr.bf16.mxu0 %v2830_v25 }
 0x2d9   : > { %2113 = vmatpush2.bf16.msra.mxu0 %v2828_v26 }
 0x2da   : > { %2114 = vmatprep.subr.bf16.mxu0 %v2833_v27 }
 0x2dd   : > { %2115 = vmatpush2.bf16.msra.mxu0 %v2831_v28 }
 0x2de   : > { %2116 = vmatprep.subr.bf16.mxu0 %v2836_v29 }
 0x2e1   : > { %2117 = vmatpush2.bf16.msra.mxu0 %v2834_v30 }
 0x2e2   : > { %2118 = vmatprep.subr.bf16.mxu0 %v2839_v31 }
 0x2e5   : > { %2119 = vmatpush2.bf16.msra.mxu0 %v2837_v32 }
 0x2e6   : > { %2120 = vmatprep.subr.bf16.mxu0 %v2842_v33 }
 0x2e9   : > { %2121 = vmatpush2.bf16.msra.mxu0 %v2840_v34 }
 0x2ea   : > { %2122 = vmatprep.subr.bf16.mxu0 %v2845_v36 }
 0x2ed   : > { %2123 = vmatpush2.bf16.msra.mxu0 %v2843_v37 }
 0x2ee   : > { %2124 = vmatprep.subr.bf16.mxu0 %v2848_v38 }
 0x2f1   : > { %2125 = vmatpush2.bf16.msra.mxu0 %v2846_v39 }
 0x374   : > { %v1717_v51 = vpop.f32.mrf.mxu0 }
 0x375   : > { %v1718_v52 = vadd.f32 %v1717_v51, %v1594_v40 }
 0x376   : > { %v1719_v53 = vpop.f32.mrf.mxu0 }
 0x377   : > { %v1720_v56 = vadd.f32 %v1719_v53, %v1596_v41  ;;  %v1868_v60 = vadd.f32 %v1859_v46, %v1718_v52 }
 0x378   : > { %v1721_v58 = vpop.f32.mrf.mxu0 }
 0x379   : > { %v1869_v24 = vadd.f32 %v1861_v50, %v1720_v56  ;;  %v1722_v59 = vadd.f32 %v1721_v58, %v1598_v42  ;;  %v1880_v35 = vadd.f32 %v1875_v62, %v1868_v60 }
 0x37a   : > { %v1723_v61 = vpop.f32.mrf.mxu0 }
 0x37b   : > { %v1870_v1 = vadd.f32 %v1863_v57, %v1722_v59  ;;  %v1724_v2 = vadd.f32 %v1723_v61, %v1600_v47  ;;  %v1881_v18 = vadd.f32 %v1879_v63, %v1869_v24  ;;  %v1884_v10 = vmax.f32 %v1880_v35, 0.0 }
 0x37d   : > { %v1882_v4 = vadd.f32 %v1875_v62, %v1870_v1  ;;  %v1871_v5 = vadd.f32 %v1865_v3, %v1724_v2  ;;  %v1885_v8 = vmax.f32 %v1881_v18, 0.0 }
 0x37f   : > { %v1883_v6 = vadd.f32 %v1879_v63, %v1871_v5  ;;  %v1886_v7 = vmax.f32 %v1882_v4, 0.0 }
 0x381   : > { %v1887_v9 = vmax.f32 %v1883_v6, 0.0  ;;  %v1888_v12 = vpack.c.bf16 %v1886_v7, %v1884_v10 }
 0x383   : > { %v1889_v11 = vpack.c.bf16 %v1887_v9, %v1885_v8 }
 0x385   : > { %2126 = vmatprep.mubr.bf16.mxu0 %v1889_v11 }
 0x386   : > { %2127 = vmatmul.mubr.bf16.vlgmr.msra.gmra.mxu0 %v1888_v12 }
 0x446   : > { %v2128_v15 = vpop.f32.mrf.mxu0 }
 0x447   : > { %v2129_v16 = vadd.f32 %v2128_v15, %v1927_v14 }
 0x448   : > { %v2130_v17 = vpop.f32.mrf.mxu0 }
 0x449   : > { %v2137_v19 = vmax.f32 %v2129_v16, 0.0  ;;  %v2131_v20 = vadd.f32 %v2130_v17, %v1931_v0 }
 0x44a   : > { %v2132_v21 = vpop.f32.mrf.mxu0 }
 0x44b   : > { %2141 = vst [vmem:[%s778_s25] sm:$0xff] %v2137_v19  ;;  %v2138_v22 = vmax.f32 %v2131_v20, 0.0  ;;  %v2133_v23 = vadd.f32 %v2132_v21, %v1927_v14 }
 0x44c   : > { %v2134_v25 = vpop.f32.mrf.mxu0 }
 0x44d   : > { %2142 = vst [vmem:[%s778_s25 + $0x8] sm:$0xff] %v2138_v22  ;;  %v2139_v26 = vmax.f32 %v2133_v23, 0.0  ;;  %v2135_v27 = vadd.f32 %v2134_v25, %v1931_v0 }
 0x44f   : > { %2143 = vst [vmem:[%s778_s25 + $0x10] sm:$0xff] %v2139_v26  ;;  %v2140_v28 = vmax.f32 %v2135_v27, 0.0 }
 0x451   : > { %2144 = vst [vmem:[%s778_s25 + $0x18] sm:$0xff] %v2140_v28 }
 0x452   : > { %3074 = shalt.err (!%p3071_p11)
}
 0x453   : > { %s3075_s16 = scalar_lea.hbm %s3689_s13, 512  ;;  %s3079_s3 = scalar_lea.hbm %s3809_s11, 1024 }
 0x454   : > { %p3076_p12 = scmp.ne.s32.totalorder %s3689_s13, %s3075_s16  ;;  %p3080_p4 = scmp.lt.s32.totalorder %s3689_s13, %s3809_s11 }
 0x455   : > { %p3081_p5 = scmp.lt.s32.totalorder %s3079_s3, %s3075_s16 }
 0x456   : > { %p3077_p13 = pnand %p3076_p12, %p3810_p3 }
 0x457   : > { %p3082_p8 = por %p3081_p5, %p3080_p4 }
 0x458   : > { %p3078_p0 = pneg %p3077_p13 }
 0x45a   : > { %p3083_p10 = pnand %p3082_p8, %p3078_p0 }
 0x45c   : > { %3086 = shalt.err (!%p3083_p10)
}
 0x45d   : > { %s3163_s25 = smov 256   ;;  %s3164_s22 = smov 16  }
 0x45e   : > { %2624 = dma.vmem_to_hbm [thread:$0]  (%p3810_p3), %s3684_s8, 512, %s3689_s13, %s2146_s5, %s3163_s25, %s3163_s25, %s3164_s22  }
 0x45f PF: > { %s2174_s18 = sand.u32 1, %s3133_s0   ;;  %p3811_p1 = scmp.ne.s32.totalorder %s3791_s26, 0 }
 0x460   : > { %p3812_p9 = scmp.ge.s32.totalorder %s3145_s21, 2  ;;  %s2175_s28 = scalar_lea.sflag [#allocation4], %s2174_s18 }
 0x462   : > { %p2653_p7 = pnand %p3812_p9, %p3811_p1 }
 0x464   : > { %p2654_p6 = pneg %p2653_p7 }
 0x466   : > { %3128 = dma.done.wait (%p2654_p6), %s2175_s28, 512  }
 0x467   : > { %3130 = vsyncadd (%p2654_p6), %s2175_s28, 4294966784  ;;  %s3813_s21 = sld [smem:[#allocation25_spill]]  ;;  %s3816_s0 = smov %s3137_s30 }
 0x468   : > { %s3814_s19 = sld [smem:[#allocation24_spill]] }
 0x469   : > { %s3815_s20 = sld [smem:[#allocation26_spill]] }
 0x46d   : > { %p38_p2 = scmp.ge.s32.totalorder %s3813_s21, 4  }
 0x46e   : > { %s3817_s30 = smov %s3814_s19 }
 0x46f   :  { %40 = sbr.rel (!%p38_p2) target bundleno = 24 (0x18), region = 187 }
 0x474   :  { %2180 = vsyncpa [#allocation3], 1 }
 0x475   :  { %2182 = vsyncpa [#allocation3 + $0x1], 1 }
 0x476   :  { %2183 = vsyncpa [#allocation6], 1 }
 0x477   :  { %2185 = vsyncpa [#allocation6 + $0x1], 1 }
 0x478   :  { %2186 = vsyncpa [#allocation9], 1 }
 0x479   :  { %2187 = vsyncpa [#allocation12], 1 }
 0x47a   :  { %2188 = vsyncpa [#allocation15], 1 }
 0x47b   :  { %2189 = vsyncpa [#allocation4], 1 }
 0x47c   :  { %2191 = vsyncpa [#allocation4 + $0x1], 1 }

</bundles_post_ra>
